<compile_context>
chip_gen: v5e
topology: v5e:2x2
jax: 0.10.0
libtpu: 0.0.40
codegen_flags: <defaults>
</compile_context>

<pallas_src>
import functools

import jax
import jax.numpy as jnp
from jax.experimental import pallas as pl
from jax.experimental.pallas import tpu as pltpu

_LANE = 128
_SUB = 8


def _round_up(x, m):
    return (x + m - 1) // m * m


def _vmem_block_bytes(shape, dtype):
    """Rough VMEM footprint of one block (minor dims padded to the (8,128) tile)."""
    item = jnp.dtype(dtype).itemsize
    lead = 1
    for d in shape[:-2]:
        lead *= int(d)
    sub = _round_up(int(shape[-2]), _SUB)
    lane = _round_up(int(shape[-1]), _LANE)
    return lead * sub * lane * item


# ----------------------------------------------------------------------------
# Fused Pallas kernel: per-scale (VPU layer-1 + MLP) -> max over K -> concat
#                      -> final MLP -> lane-dense bf16 store
# ----------------------------------------------------------------------------
def _fused_msg_kernel(n_scales, rem_layers_per_scale, num_final, act_dtype, *refs):
    """refs = (p_0, q_0, b1_0, ..., per-scale (w,b)*, final (w,b)*, out)."""
    o_ref = refs[-1]
    pos = 3 * n_scales

    def mlp_layer(h, w_ref, b_ref):
        # bf16 MXU matmul, f32 accumulate; bias+ReLU epilogue in f32, then the
        # activation is cast to act_dtype (bf16 on v6e/v7x halves vreg/VMEM
        # pressure of pooling & concat; pass f32 on v5e — no bf16 VALU there).
        acc = jnp.dot(h.astype(jnp.bfloat16), w_ref[...],
                      preferred_element_type=jnp.float32)
        return jnp.maximum(acc + b_ref[...], 0.0).astype(act_dtype)

    pooled = []
    for s in range(n_scales):
        p_ref, q_ref, b1_ref = refs[3 * s], refs[3 * s + 1], refs[3 * s + 2]
        k, rows, c1p = p_ref.shape
        # Layer 1 without an MXU pass: the 1x1 conv over [feat, xyz - center]
        # was split in the wrapper into p (per raw point, gathered) and q (per
        # center); here it is just subtract + bias + ReLU on the VPU.
        h = jnp.maximum(p_ref[...].astype(jnp.float32)
                        - q_ref[...][None, :, :] + b1_ref[...],
                        0.0).astype(act_dtype)
        h = h.reshape(k * rows, c1p)                    # leading-dim-only reshape
        for _ in range(rem_layers_per_scale[s]):
            h = mlp_layer(h, refs[pos], refs[pos + 1])
            pos += 2
        cp = h.shape[-1]
        # (k, group)-major rows: K-max over the LEADING axis = K-1 full-vreg
        # VPU maxes that co-issue for free under the MXU (no XLU).
        pooled.append(jnp.max(h.reshape(k, rows, cp), axis=0))
    h = jnp.concatenate(pooled, axis=-1) if n_scales > 1 else pooled[0]
    for _ in range(num_final):
        h = mlp_layer(h, refs[pos], refs[pos + 1])
        pos += 2
    o_ref[...] = h.astype(o_ref.dtype)


# ----------------------------------------------------------------------------
# Plain-JAX glue (sampling / grouping — data-dependent gather)
# ----------------------------------------------------------------------------
def index_points(points, idx):
    """points: [B, N, C], idx: [B, ...] int -> [B, ..., C]."""
    B = points.shape[0]
    batch_idx = jnp.arange(B).reshape((B,) + (1,) * (idx.ndim - 1))
    return points[batch_idx, idx]


def random_point_sample(key, xyz, npoint):
    """Random index sampling, [B, npoint] int32 (with replacement, randint-like)."""
    B, N, _ = xyz.shape
    return jax.random.randint(key, (B, npoint), 0, N, dtype=jnp.int32)


def query_ball_point(radius, nsample, xyz, new_xyz):
    """Ball query: [B, S, nsample] indices into xyz (first nsample in-radius)."""
    B, N, _ = xyz.shape
    S = new_xyz.shape[1]
    diff = new_xyz[:, :, None, :] - xyz[:, None, :, :]
    sqrdists = jnp.sum(diff * diff, axis=-1)                      # [B, S, N]
    idx = jnp.broadcast_to(jnp.arange(N, dtype=jnp.int32), (B, S, N))
    idx = jnp.where(sqrdists > radius ** 2, N, idx)
    # Partial selection (replaces full sort): nsample smallest masked indices,
    # returned in ascending order == sort(...)[:nsample].
    neg_vals, _ = jax.lax.top_k(-idx, nsample)
    group_idx = -neg_vals                                         # [B, S, K]
    group_first = jnp.broadcast_to(group_idx[:, :, :1], group_idx.shape)
    group_idx = jnp.where(group_idx == N, group_first, group_idx)
    return group_idx


# ----------------------------------------------------------------------------
# Parameters (deterministic init, BN folded in eval mode)
# ----------------------------------------------------------------------------
def _fold_bn(w, b, gamma, beta, mean, var, eps=1e-5):
    scale = gamma / jnp.sqrt(var + eps)
    return w * scale[None, :], (b - mean[None, :]) * scale[None, :] + beta[None, :]


def init_params(key, in_channel, mlp_list, final_list):
    params = {"scales": [], "final": []}
    for mlp in mlp_list:
        last = in_channel + 3
        layers = []
        for out in mlp:
            key, kw = jax.random.split(key)
            w = jax.random.normal(kw, (last, out), jnp.float32) * (2.0 / last) ** 0.5
            b = jnp.zeros((1, out), jnp.float32)
            gamma = jnp.ones((out,), jnp.float32)
            beta = jnp.zeros((out,), jnp.float32)
            mean = jnp.zeros((out,), jnp.float32)
            var = jnp.ones((out,), jnp.float32)
            layers.append(_fold_bn(w, b, gamma, beta, mean, var))
            last = out
        params["scales"].append(layers)

    last = sum(m[-1] for m in mlp_list)
    for out in final_list:
        key, kw = jax.random.split(key)
        w = jax.random.normal(kw, (last, out), jnp.float32) * (2.0 / last) ** 0.5
        b = jnp.zeros((1, out), jnp.float32)
        gamma = jnp.ones((out,), jnp.float32)
        beta = jnp.zeros((out,), jnp.float32)
        mean = jnp.zeros((out,), jnp.float32)
        var = jnp.ones((out,), jnp.float32)
        params["final"].append(_fold_bn(w, b, gamma, beta, mean, var))
        last = out
    return params


# ----------------------------------------------------------------------------
# Forward pass (PointNetMSGRandomSample.forward)
# ----------------------------------------------------------------------------
def pointnet_msg_random_sample(params, xyz, features, *, npoint,
                               radius_list, nsample_list, sample_key,
                               tile=1024, act_dtype=jnp.bfloat16,
                               out_dtype=jnp.bfloat16):
    """xyz: [B, N, 3], features: [B, N, D]  ->  ([B, S, 3], [B, S, D'])."""
    B, N, _ = xyz.shape
    S = npoint
    if npoint != N:
        fpx_idx = random_point_sample(sample_key, xyz, S)
        new_xyz = index_points(xyz, fpx_idx)                      # [B, S, 3]
    else:
        new_xyz = xyz

    D = features.shape[-1] if features is not None else 0
    pts = (jnp.concatenate([features, xyz], axis=-1)
           if features is not None else xyz)                      # [B, N, D+3]
    C0 = pts.shape[-1]

    G = B * S
    # Big row tiles amortize per-step pipeline overhead; clamp for tiny inputs.
    # (On v7x sweep 512-768: 64 MiB VMEM vs 128 MiB on v5e/v6e.)
    tile = max(_SUB, min(tile, _round_up(G, _SUB)))
    # Keep >= 2 grid steps when possible so the "parallel" axis can feed both
    # v7x TensorCores (a 1-step grid idles one core).
    if _round_up(G, _SUB) > _SUB and _round_up(G, tile) // tile < 2:
        tile = max(_SUB, _round_up(_round_up(G, _SUB) // 2, _SUB))
    G_pad = _round_up(G, tile)
    grid = (G_pad // tile,)

    n_scales = len(radius_list)
    batch_idx = jnp.arange(B, dtype=jnp.int32)

    kernel_args, in_specs = [], []
    io_bytes = 0

    def _add_input(arr, block_shape, index_map):
        nonlocal io_bytes
        kernel_args.append(arr)
        in_specs.append(pl.BlockSpec(block_shape, index_map))
        io_bytes += _vmem_block_bytes(block_shape, arr.dtype)

    # --- per-scale: decomposed layer-1 inputs (gathered p, centers' q, bias) --
    rem_layers, scale_real, scale_pad, c1_pads = [], [], [], []
    for i, radius in enumerate(radius_list):
        K = nsample_list[i]
        layers = params["scales"][i]
        w1, b1 = layers[0]
        C1 = w1.shape[1]
        C1p = _round_up(C1, _SUB)
        c1_pads.append(C1p)

        # p_j = [feat_j, xyz_j] @ W1 over the N raw points (one small matmul);
        # q_s = center_s @ W1_xyz.  Layer 1 then needs no G*K-row MXU pass.
        p = jnp.dot(pts.reshape(B * N, C0), w1).reshape(B, N, C1)
        q = jnp.dot(new_xyz.reshape(B * S, 3), w1[D:D + 3, :]).reshape(B, S, C1)

        group_idx = query_ball_point(radius, K, xyz, new_xyz)     # [B, S, K]
        # Gather in bf16 directly into the (k, group)-major layout; single pad.
        # TODO(synk): fuse this gather into the kernel (PrefetchScalarGridSpec
        # + manual make_async_copy on group_idx) to avoid materializing the
        # padded [K, G_pad, C1p] tensor in HBM at production N.
        idx_km = jnp.transpose(group_idx, (2, 0, 1))              # [K, B, S]
        p_grp = p.astype(jnp.bfloat16)[batch_idx[None, :, None], idx_km]
        grouped = p_grp.reshape(K, G, C1)
        grouped = jnp.pad(grouped, ((0, 0), (0, G_pad - G), (0, C1p - C1)))

        q_flat = jnp.pad(q.reshape(G, C1).astype(jnp.float32),
                         ((0, G_pad - G), (0, C1p - C1)))
        b1p = jnp.zeros((1, C1p), jnp.float32).at[:, :C1].set(b1)

        _add_input(grouped, (K, tile, C1p), lambda g: (0, g, 0))
        _add_input(q_flat, (tile, C1p), lambda g: (g, 0))
        _add_input(b1p, (1, C1p), lambda g: (0, 0))
        rem_layers.append(len(layers) - 1)

    # --- pad / pack the folded conv+BN parameters (zero-padded, lane-dense) ---
    param_args, param_specs = [], []
    param_bytes = 0

    def _add_param(wp, bp):
        nonlocal param_bytes
        # TODO(synk): on v7x add pipeline_mode=pl.Buffered(1) to these specs
        # (constant index_map -> fetched once) to reclaim the 2x reservation.
        param_args.extend([wp.astype(jnp.bfloat16), bp])
        param_specs.append(pl.BlockSpec(wp.shape, lambda g: (0, 0)))
        param_specs.append(pl.BlockSpec(bp.shape, lambda g: (0, 0)))
        param_bytes += (_vmem_block_bytes(wp.shape, jnp.bfloat16)
                        + _vmem_block_bytes(bp.shape, jnp.float32))

    for i in range(n_scales):
        layers = params["scales"][i]
        cin_pad = c1_pads[i]
        cout = layers[0][0].shape[1]
        cout_pad = cin_pad
        for (w, b) in layers[1:]:
            cout = w.shape[1]
            cout_pad = _round_up(cout, _LANE)
            wp = jnp.zeros((cin_pad, cout_pad), jnp.float32)
            wp = wp.at[:w.shape[0], :cout].set(w)
            bp = jnp.zeros((1, cout_pad), jnp.float32).at[:, :cout].set(b)
            _add_param(wp, bp)
            cin_pad = cout_pad
        scale_real.append(cout)
        scale_pad.append(cout_pad)

    # TODO(synk): PointNetMSGInputPoint source not provided; final_list is
    # modeled as a stack of 1x1 Conv + BN + ReLU on the concatenated
    # multi-scale features (the PReLU arg is not forwarded in the reference).
    final_layers = params["final"]
    cin_pad = sum(scale_pad)
    for li, (w, b) in enumerate(final_layers):
        cout = w.shape[1]
        cout_pad = _round_up(cout, _LANE)
        wp = jnp.zeros((cin_pad, cout_pad), jnp.float32)
        if li == 0:
            # scatter the real rows into the padded concat layout
            src = dst = 0
            for creal, cpad in zip(scale_real, scale_pad):
                wp = wp.at[dst:dst + creal, :cout].set(w[src:src + creal, :])
                src += creal
                dst += cpad
        else:
            wp = wp.at[:w.shape[0], :cout].set(w)
        bp = jnp.zeros((1, cout_pad), jnp.float32).at[:, :cout].set(b)
        _add_param(wp, bp)
        cin_pad = cout_pad
    final_real = final_layers[-1][0].shape[1]
    final_pad = cin_pad

    # --- VMEM limit from actual block footprint (not a blanket constant) ------
    a_item = 4 + jnp.dtype(act_dtype).itemsize
    act_bytes = sum(K * tile * _LANE * a_item for K in nsample_list)
    act_bytes += tile * _round_up(sum(scale_pad), _LANE) * a_item
    out_block_bytes = _vmem_block_bytes((tile, final_pad), out_dtype)
    vmem_limit = int(1.5 * (2 * (io_bytes + param_bytes + out_block_bytes)
                            + act_bytes))
    vmem_limit = max(16 * 1024 * 1024, min(vmem_limit, 100 * 1024 * 1024))

    kernel = functools.partial(_fused_msg_kernel, n_scales, tuple(rem_layers),
                               len(final_layers), act_dtype)
    out = pl.pallas_call(
        kernel,
        out_shape=jax.ShapeDtypeStruct((G_pad, final_pad), out_dtype),
        grid=grid,
        in_specs=in_specs + param_specs,
        out_specs=pl.BlockSpec((tile, final_pad), lambda g: (g, 0)),
        compiler_params=pltpu.CompilerParams(
            dimension_semantics=("parallel",),
            vmem_limit_bytes=vmem_limit),
    )(*kernel_args, *param_args)

    new_features = out[:G, :final_real].reshape(B, S, final_real)
    return new_xyz, new_features


# ----------------------------------------------------------------------------
if __name__ == "__main__":
    B, N, D = 2, 32, 4          # batch, num points, feature channels
    npoint = 16
    radius_list = [0.2, 0.4]
    nsample_list = [8, 16]
    mlp_list = [[16, 32], [16, 32]]
    final_list = [64]

    key = jax.random.PRNGKey(0)
    k_xyz, k_feat, k_sample, k_param = jax.random.split(key, 4)

    xyz = jax.random.uniform(k_xyz, (B, N, 3), dtype=jnp.float32)
    features = jax.random.normal(k_feat, (B, N, D), dtype=jnp.float32)

    params = init_params(k_param, in_channel=D, mlp_list=mlp_list,
                         final_list=final_list)

    new_xyz, new_features = pointnet_msg_random_sample(
        params, xyz, features,
        npoint=npoint, radius_list=radius_list, nsample_list=nsample_list,
        sample_key=k_sample)

    jax.block_until_ready((new_xyz, new_features))
    assert new_xyz.shape == (B, npoint, 3)
    assert new_features.shape == (B, npoint, final_list[-1])
    print("KERNEL_OK")
</pallas_src>

<mosaic_0001>
module attributes {stable_mosaic.version = 11 : i64} {
  func.func @_fused_msg_kernel(%arg0: i32, %arg1: memref<8x16x16xbf16, #tpu.memory_space<vmem>>, %arg2: memref<16x16xf32, #tpu.memory_space<vmem>>, %arg3: memref<1x16xf32, #tpu.memory_space<vmem>>, %arg4: memref<16x16x16xbf16, #tpu.memory_space<vmem>>, %arg5: memref<16x16xf32, #tpu.memory_space<vmem>>, %arg6: memref<1x16xf32, #tpu.memory_space<vmem>>, %arg7: memref<16x128xbf16, #tpu.memory_space<vmem>>, %arg8: memref<1x128xf32, #tpu.memory_space<vmem>>, %arg9: memref<16x128xbf16, #tpu.memory_space<vmem>>, %arg10: memref<1x128xf32, #tpu.memory_space<vmem>>, %arg11: memref<256x128xbf16, #tpu.memory_space<vmem>>, %arg12: memref<1x128xf32, #tpu.memory_space<vmem>>, %arg13: memref<16x128xbf16, #tpu.memory_space<vmem>>) attributes {dimension_semantics = [#tpu.dimension_semantics<parallel>], iteration_bounds = array<i64: 2>, scalar_prefetch = 0 : i64, scratch_operands = 0 : i64, tpu.core_type = #tpu.core_type<tc>, window_params = [{transform_indices = @transform_0, window_bounds = array<i64: 8, 16, 16>}, {transform_indices = @transform_1, window_bounds = array<i64: 16, 16>}, {pipeline_mode = #tpu.pipeline_mode<synchronous>, transform_indices = @transform_2, window_bounds = array<i64: 1, 16>}, {transform_indices = @transform_3, window_bounds = array<i64: 16, 16, 16>}, {transform_indices = @transform_4, window_bounds = array<i64: 16, 16>}, {pipeline_mode = #tpu.pipeline_mode<synchronous>, transform_indices = @transform_5, window_bounds = array<i64: 1, 16>}, {pipeline_mode = #tpu.pipeline_mode<synchronous>, transform_indices = @transform_6, window_bounds = array<i64: 16, 128>}, {pipeline_mode = #tpu.pipeline_mode<synchronous>, transform_indices = @transform_7, window_bounds = array<i64: 1, 128>}, {pipeline_mode = #tpu.pipeline_mode<synchronous>, transform_indices = @transform_8, window_bounds = array<i64: 16, 128>}, {pipeline_mode = #tpu.pipeline_mode<synchronous>, transform_indices = @transform_9, window_bounds = array<i64: 1, 128>}, {pipeline_mode = #tpu.pipeline_mode<synchronous>, transform_indices = @transform_10, window_bounds = array<i64: 256, 128>}, {pipeline_mode = #tpu.pipeline_mode<synchronous>, transform_indices = @transform_11, window_bounds = array<i64: 1, 128>}, {transform_indices = @transform_12, window_bounds = array<i64: 16, 128>}]} {
    %c0 = arith.constant 0 : index
    %c0_0 = arith.constant 0 : index
    %c0_1 = arith.constant 0 : index
    %0 = vector.load %arg1[%c0, %c0_0, %c0_1] : memref<8x16x16xbf16, #tpu.memory_space<vmem>>, vector<8x16x16xbf16>
    %1 = arith.extf %0 : vector<8x16x16xbf16> to vector<8x16x16xf32>
    %c0_2 = arith.constant 0 : index
    %c0_3 = arith.constant 0 : index
    %2 = vector.load %arg2[%c0_2, %c0_3] : memref<16x16xf32, #tpu.memory_space<vmem>>, vector<16x16xf32>
    %3 = vector.shape_cast %2 : vector<16x16xf32> to vector<1x16x16xf32>
    %4 = vector.broadcast %3 : vector<1x16x16xf32> to vector<8x16x16xf32>
    %5 = arith.subf %1, %4 : vector<8x16x16xf32>
    %c0_4 = arith.constant 0 : index
    %c0_5 = arith.constant 0 : index
    %6 = vector.load %arg3[%c0_4, %c0_5] : memref<1x16xf32, #tpu.memory_space<vmem>>, vector<1x16xf32>
    %7 = vector.shape_cast %6 : vector<1x16xf32> to vector<1x1x16xf32>
    %8 = vector.broadcast %7 : vector<1x1x16xf32> to vector<8x16x16xf32>
    %9 = arith.addf %5, %8 : vector<8x16x16xf32>
    %cst = arith.constant 0.000000e+00 : f32
    %10 = vector.broadcast %cst : f32 to vector<8x16x16xf32>
    %11 = arith.maximumf %9, %10 : vector<8x16x16xf32>
    %12 = arith.truncf %11 : vector<8x16x16xf32> to vector<8x16x16xbf16>
    %13 = vector.shape_cast %12 : vector<8x16x16xbf16> to vector<128x16xbf16>
    %c0_6 = arith.constant 0 : index
    %c0_7 = arith.constant 0 : index
    %14 = vector.load %arg7[%c0_6, %c0_7] : memref<16x128xbf16, #tpu.memory_space<vmem>>, vector<16x128xbf16>
    %cst_8 = arith.constant dense<0.000000e+00> : vector<128x128xf32>
    %15 = tpu.matmul %13, %14, %cst_8 {dimension_numbers = #tpu.dot_dimension_numbers<[1], [0], [0], [1], [0, 0, 1, 1], [], []>} : vector<128x16xbf16>, vector<16x128xbf16>, vector<128x128xf32> -> vector<128x128xf32>
    %c0_9 = arith.constant 0 : index
    %c0_10 = arith.constant 0 : index
    %16 = vector.load %arg8[%c0_9, %c0_10] : memref<1x128xf32, #tpu.memory_space<vmem>>, vector<1x128xf32>
    %17 = vector.broadcast %16 : vector<1x128xf32> to vector<128x128xf32>
    %18 = arith.addf %15, %17 : vector<128x128xf32>
    %cst_11 = arith.constant 0.000000e+00 : f32
    %19 = vector.broadcast %cst_11 : f32 to vector<128x128xf32>
    %20 = arith.maximumf %18, %19 : vector<128x128xf32>
    %21 = arith.truncf %20 : vector<128x128xf32> to vector<128x128xbf16>
    %22 = vector.shape_cast %21 : vector<128x128xbf16> to vector<8x16x128xbf16>
    %cst_12 = arith.constant dense<0xFF80> : vector<16x128xbf16>
    %23 = vector.multi_reduction <maximumf>, %22, %cst_12 [0] : vector<8x16x128xbf16> to vector<16x128xbf16>
    %c0_13 = arith.constant 0 : index
    %c0_14 = arith.constant 0 : index
    %c0_15 = arith.constant 0 : index
    %24 = vector.load %arg4[%c0_13, %c0_14, %c0_15] : memref<16x16x16xbf16, #tpu.memory_space<vmem>>, vector<16x16x16xbf16>
    %25 = arith.extf %24 : vector<16x16x16xbf16> to vector<16x16x16xf32>
    %c0_16 = arith.constant 0 : index
    %c0_17 = arith.constant 0 : index
    %26 = vector.load %arg5[%c0_16, %c0_17] : memref<16x16xf32, #tpu.memory_space<vmem>>, vector<16x16xf32>
    %27 = vector.shape_cast %26 : vector<16x16xf32> to vector<1x16x16xf32>
    %28 = vector.broadcast %27 : vector<1x16x16xf32> to vector<16x16x16xf32>
    %29 = arith.subf %25, %28 : vector<16x16x16xf32>
    %c0_18 = arith.constant 0 : index
    %c0_19 = arith.constant 0 : index
    %30 = vector.load %arg6[%c0_18, %c0_19] : memref<1x16xf32, #tpu.memory_space<vmem>>, vector<1x16xf32>
    %31 = vector.shape_cast %30 : vector<1x16xf32> to vector<1x1x16xf32>
    %32 = vector.broadcast %31 : vector<1x1x16xf32> to vector<16x16x16xf32>
    %33 = arith.addf %29, %32 : vector<16x16x16xf32>
    %cst_20 = arith.constant 0.000000e+00 : f32
    %34 = vector.broadcast %cst_20 : f32 to vector<16x16x16xf32>
    %35 = arith.maximumf %33, %34 : vector<16x16x16xf32>
    %36 = arith.truncf %35 : vector<16x16x16xf32> to vector<16x16x16xbf16>
    %37 = vector.shape_cast %36 : vector<16x16x16xbf16> to vector<256x16xbf16>
    %c0_21 = arith.constant 0 : index
    %c0_22 = arith.constant 0 : index
    %38 = vector.load %arg9[%c0_21, %c0_22] : memref<16x128xbf16, #tpu.memory_space<vmem>>, vector<16x128xbf16>
    %cst_23 = arith.constant dense<0.000000e+00> : vector<256x128xf32>
    %39 = tpu.matmul %37, %38, %cst_23 {dimension_numbers = #tpu.dot_dimension_numbers<[1], [0], [0], [1], [0, 0, 1, 1], [], []>} : vector<256x16xbf16>, vector<16x128xbf16>, vector<256x128xf32> -> vector<256x128xf32>
    %c0_24 = arith.constant 0 : index
    %c0_25 = arith.constant 0 : index
    %40 = vector.load %arg10[%c0_24, %c0_25] : memref<1x128xf32, #tpu.memory_space<vmem>>, vector<1x128xf32>
    %41 = vector.broadcast %40 : vector<1x128xf32> to vector<256x128xf32>
    %42 = arith.addf %39, %41 : vector<256x128xf32>
    %cst_26 = arith.constant 0.000000e+00 : f32
    %43 = vector.broadcast %cst_26 : f32 to vector<256x128xf32>
    %44 = arith.maximumf %42, %43 : vector<256x128xf32>
    %45 = arith.truncf %44 : vector<256x128xf32> to vector<256x128xbf16>
    %46 = vector.shape_cast %45 : vector<256x128xbf16> to vector<16x16x128xbf16>
    %cst_27 = arith.constant dense<0xFF80> : vector<16x128xbf16>
    %47 = vector.multi_reduction <maximumf>, %46, %cst_27 [0] : vector<16x16x128xbf16> to vector<16x128xbf16>
    %48 = tpu.concatenate %23, %47 in 1 : vector<16x128xbf16>, vector<16x128xbf16> -> vector<16x256xbf16>
    %c0_28 = arith.constant 0 : index
    %c0_29 = arith.constant 0 : index
    %49 = vector.load %arg11[%c0_28, %c0_29] : memref<256x128xbf16, #tpu.memory_space<vmem>>, vector<256x128xbf16>
    %cst_30 = arith.constant dense<0.000000e+00> : vector<16x128xf32>
    %50 = tpu.matmul %48, %49, %cst_30 {dimension_numbers = #tpu.dot_dimension_numbers<[1], [0], [0], [1], [0, 0, 1, 1], [], []>} : vector<16x256xbf16>, vector<256x128xbf16>, vector<16x128xf32> -> vector<16x128xf32>
    %c0_31 = arith.constant 0 : index
    %c0_32 = arith.constant 0 : index
    %51 = vector.load %arg12[%c0_31, %c0_32] : memref<1x128xf32, #tpu.memory_space<vmem>>, vector<1x128xf32>
    %52 = vector.broadcast %51 : vector<1x128xf32> to vector<16x128xf32>
    %53 = arith.addf %50, %52 : vector<16x128xf32>
    %cst_33 = arith.constant 0.000000e+00 : f32
    %54 = vector.broadcast %cst_33 : f32 to vector<16x128xf32>
    %55 = arith.maximumf %53, %54 : vector<16x128xf32>
    %56 = arith.truncf %55 : vector<16x128xf32> to vector<16x128xbf16>
    %c0_34 = arith.constant 0 : index
    %c0_35 = arith.constant 0 : index
    %57 = vector.load %arg13[%c0_34, %c0_35] : memref<16x128xbf16, #tpu.memory_space<vmem>>, vector<16x128xbf16>
    tpu.vector_store %arg13[%c0_34, %c0_35], %56 {strides = array<i32>} : memref<16x128xbf16, #tpu.memory_space<vmem>>, vector<16x128xbf16>,
    return
  }
  func.func @transform_0(%arg0: i32) -> (i32, i32, i32) {
    %c0_i32 = arith.constant 0 : i32
    %c0_i32_0 = arith.constant 0 : i32
    %c0_i32_1 = arith.constant 0 : i32
    return %c0_i32, %arg0, %c0_i32_0 : i32, i32, i32
  }
  func.func @transform_1(%arg0: i32) -> (i32, i32) {
    %c0_i32 = arith.constant 0 : i32
    %c0_i32_0 = arith.constant 0 : i32
    return %arg0, %c0_i32 : i32, i32
  }
  func.func @transform_2(%arg0: i32) -> (i32, i32) {
    %c0_i32 = arith.constant 0 : i32
    %c0_i32_0 = arith.constant 0 : i32
    %c0_i32_1 = arith.constant 0 : i32
    return %c0_i32, %c0_i32_0 : i32, i32
  }
  func.func @transform_3(%arg0: i32) -> (i32, i32, i32) {
    %c0_i32 = arith.constant 0 : i32
    %c0_i32_0 = arith.constant 0 : i32
    %c0_i32_1 = arith.constant 0 : i32
    return %c0_i32, %arg0, %c0_i32_0 : i32, i32, i32
  }
  func.func @transform_4(%arg0: i32) -> (i32, i32) {
    %c0_i32 = arith.constant 0 : i32
    %c0_i32_0 = arith.constant 0 : i32
    return %arg0, %c0_i32 : i32, i32
  }
  func.func @transform_5(%arg0: i32) -> (i32, i32) {
    %c0_i32 = arith.constant 0 : i32
    %c0_i32_0 = arith.constant 0 : i32
    %c0_i32_1 = arith.constant 0 : i32
    return %c0_i32, %c0_i32_0 : i32, i32
  }
  func.func @transform_6(%arg0: i32) -> (i32, i32) {
    %c0_i32 = arith.constant 0 : i32
    %c0_i32_0 = arith.constant 0 : i32
    %c0_i32_1 = arith.constant 0 : i32
    return %c0_i32, %c0_i32_0 : i32, i32
  }
  func.func @transform_7(%arg0: i32) -> (i32, i32) {
    %c0_i32 = arith.constant 0 : i32
    %c0_i32_0 = arith.constant 0 : i32
    %c0_i32_1 = arith.constant 0 : i32
    return %c0_i32, %c0_i32_0 : i32, i32
  }
  func.func @transform_8(%arg0: i32) -> (i32, i32) {
    %c0_i32 = arith.constant 0 : i32
    %c0_i32_0 = arith.constant 0 : i32
    %c0_i32_1 = arith.constant 0 : i32
    return %c0_i32, %c0_i32_0 : i32, i32
  }
  func.func @transform_9(%arg0: i32) -> (i32, i32) {
    %c0_i32 = arith.constant 0 : i32
    %c0_i32_0 = arith.constant 0 : i32
    %c0_i32_1 = arith.constant 0 : i32
    return %c0_i32, %c0_i32_0 : i32, i32
  }
  func.func @transform_10(%arg0: i32) -> (i32, i32) {
    %c0_i32 = arith.constant 0 : i32
    %c0_i32_0 = arith.constant 0 : i32
    %c0_i32_1 = arith.constant 0 : i32
    return %c0_i32, %c0_i32_0 : i32, i32
  }
  func.func @transform_11(%arg0: i32) -> (i32, i32) {
    %c0_i32 = arith.constant 0 : i32
    %c0_i32_0 = arith.constant 0 : i32
    %c0_i32_1 = arith.constant 0 : i32
    return %c0_i32, %c0_i32_0 : i32, i32
  }
  func.func @transform_12(%arg0: i32) -> (i32, i32) {
    %c0_i32 = arith.constant 0 : i32
    %c0_i32_0 = arith.constant 0 : i32
    return %arg0, %c0_i32 : i32, i32
  }
}

</mosaic_0001>

<bundles_post_ra>
// kernel: tpu_custom_call.1
= control target key start
LH: loop header
LB: loop body
LE: loop exit
PB: predicated region body
PF: predicated region fallthrough
CT: control target
= control target key end

     0   :  { %s2837_s0 = inlined_call_operand.vmem [shape: bf16[8,32,16], index: 0, kind: input, shape index: {}]   ;;  %s2838_s1 = inlined_call_operand.vmem [shape: f32[32,16], index: 1, kind: input, shape index: {}]   ;;  %s2839_s2 = inlined_call_operand.vmem [shape: f32[1,16], index: 2, kind: input, shape index: {}]   ;;  %s2840_s3 = inlined_call_operand.vmem [shape: bf16[16,32,16], index: 3, kind: input, shape index: {}]   ;;  %s2841_s4 = inlined_call_operand.vmem [shape: f32[32,16], index: 4, kind: input, shape index: {}]   ;;  %s2842_s5 = inlined_call_operand.vmem [shape: f32[1,16], index: 5, kind: input, shape index: {}]   ;;  %s2843_s6 = inlined_call_operand.vmem [shape: bf16[16,128], index: 6, kind: input, shape index: {}]   ;;  %s2844_s7 = inlined_call_operand.vmem [shape: f32[1,128], index: 7, kind: input, shape index: {}]   ;;  %s2845_s8 = inlined_call_operand.vmem [shape: bf16[16,128], index: 8, kind: input, shape index: {}]   ;;  %s2846_s9 = inlined_call_operand.vmem [shape: f32[1,128], index: 9, kind: input, shape index: {}]   ;;  %s2847_s10 = inlined_call_operand.vmem [shape: bf16[256,128], index: 10, kind: input, shape index: {}]   ;;  %s2848_s11 = inlined_call_operand.vmem [shape: f32[1,128], index: 11, kind: input, shape index: {}]   ;;  %s2849_s12 = inlined_call_operand.hbm [shape: bf16[32,128], index: 12, kind: output, shape index: {}]  }
   0x1   :  { %2851 = sst [smem:[#allocation9_spill]] %s2837_s0 }
   0x2   :  { %2852 = sst [smem:[#allocation10_spill]] %s2840_s3 }
   0x3   :  { %2853 = sst [smem:[#allocation11_spill]] %s2843_s6 }
   0x4   :  { %2854 = sst [smem:[#allocation12_spill]] %s2845_s8 }
   0x5   :  { %17 = vsyncpa [#allocation5], 0 }
   0x6   :  { %19 = vsyncpa [#allocation5 + $0x1], 0  ;;  %s2345_s21 = smov 0   ;;  %s2347_s22 = smov 0  }
   0x7   :  { %s2349_s23 = smov 0   ;;  %s2351_s24 = smov 0  }
   0x8 LB: > { %2855 = sst [smem:[#allocation7_spill]] %s2272_s23  ;;  %s2366_s25 = sadd.s32 4294967295, %s2276_s24   ;;  %s2276_s24 = sphi %s2351_s24, %s2868_s24   ;;  %s2272_s23 = sphi %s2349_s23, %s2865_s23   ;;  %s2268_s22 = sphi %s2347_s22, %s2867_s22   ;;  %s2264_s21 = sphi %s2345_s21, %s2866_s21  }
   0x9   : > { %s1903_s26 = sadd.s32 4294967294, %s2276_s24   ;;  %s2370_s27 = sadd.s32 1, %s2276_s24  }
   0xa   : > { %s32_s28 = sadd.s32 1, %s2272_s23  ;;  %s29_s29 = ssub.s32 %s2276_s24, %s2370_s27 }
   0xb   : > { %p39_p0 = scmp.ne.s32.totalorder %s2272_s23, %s2268_s22  ;;  %p30_p1 = scmp.eq.s32.totalorder %s29_s29, 0 }
   0xc   : > { %p40_p2 = scmp.eq.s32.totalorder %s2276_s24, 0  ;;  %p315_p3 = scmp.eq.s32.totalorder %s2366_s25, 1 }
   0xd   : > { %p320_p4 = scmp.ne.s32.totalorder %s2268_s22, %s2264_s21  ;;  %p321_p7 = scmp.eq.s32.totalorder %s1903_s26, 1 }
   0xe   : > { %s2382_s30 = scalar_select %p30_p1, %s2272_s23, %s32_s28  }
   0xf   : > { %p2384_p5 = por %p40_p2, %p39_p0  ;;  %p2388_p6 = por %p315_p3, %p39_p0 }
  0x10   : > { %2856 = sst [smem:[#allocation8_spill]] %s2382_s30  ;;  %p2392_p8 = por %p321_p7, %p320_p4 }
  0x11   : > { %p1905_p9 = scmp.ge.s32.totalorder %s2276_s24, 2 }
  0x13   : > { %361 = sbr.rel (%p1905_p9) target bundleno = 68 (0x44), region = 48 }
  0x18   : > { %364 = sbr.rel (!%p2384_p5) target bundleno = 42 (0x2a), region = 52  ;;  %s366_s16 = sand.u32 (%p2384_p5), 1, %s2272_s23  }
  0x19   : > { %s2021_s17 = sshll.u32 (%p2384_p5), %s2276_s24, 3  ;;  %s1906_s18 = sshll.u32 (%p2384_p5), %s366_s16, 6 }
  0x1a   : > { %s2860_s0 = sld [smem:[#allocation9_spill]] (%p2384_p5)  ;;  %s368_s28 = scalar_lea.vmem (%p2384_p5), [#allocation2], %s1906_s18 }
  0x20   : > { %s371_s26 = scalar_lea.vmem %s2860_s0, %s2021_s17 }
  0x21   : > { %v388_v0 = vld [vmem:[%s371_s26] sm:$0xff]   ;;  %v392_v1 = vld [vmem:[%s371_s26 + $0x10] sm:$0xff]  }
  0x22   : > { %v396_v2 = vld [vmem:[%s371_s26 + $0x20] sm:$0xff]   ;;  %389 = vst [vmem:[%s368_s28] sm:$0xff] %v388_v0   ;;  %v400_v3 = vld [vmem:[%s371_s26 + $0x30] sm:$0xff]  }
  0x23   : > { %393 = vst [vmem:[%s368_s28 + $0x8] sm:$0xff] %v392_v1   ;;  %v404_v4 = vld [vmem:[%s371_s26 + $0x40] sm:$0xff]   ;;  %v408_v5 = vld [vmem:[%s371_s26 + $0x50] sm:$0xff]  }
  0x24   : > { %397 = vst [vmem:[%s368_s28 + $0x10] sm:$0xff] %v396_v2   ;;  %v412_v6 = vld [vmem:[%s371_s26 + $0x60] sm:$0xff]   ;;  %v416_v7 = vld [vmem:[%s371_s26 + $0x70] sm:$0xff]  }
  0x25   : > { %401 = vst [vmem:[%s368_s28 + $0x18] sm:$0xff] %v400_v3  }
  0x26   : > { %405 = vst [vmem:[%s368_s28 + $0x20] sm:$0xff] %v404_v4  }
  0x27   : > { %409 = vst [vmem:[%s368_s28 + $0x28] sm:$0xff] %v408_v5  }
  0x28   : > { %413 = vst [vmem:[%s368_s28 + $0x30] sm:$0xff] %v412_v6  }
  0x29   : > { %417 = vst [vmem:[%s368_s28 + $0x38] sm:$0xff] %v416_v7  }
  0x2a PF: > { %484 = sbr.rel (!%p2384_p5) target bundleno = 68 (0x44), region = 97  ;;  %s486_s29 = sand.u32 (%p2384_p5), 1, %s2272_s23  }
  0x2b   : > { %s2022_s16 = sshll.u32 (%p2384_p5), %s2276_s24, 3  ;;  %s1909_s17 = sshll.u32 (%p2384_p5), %s486_s29, 7 }
  0x2c   : > { %s2861_s3 = sld [smem:[#allocation10_spill]] (%p2384_p5)  ;;  %s488_s13 = scalar_lea.vmem (%p2384_p5), [#allocation3], %s1909_s17 }
  0x32   : > { %s2413_s20 = scalar_lea.vmem %s2861_s3, %s2022_s16 }
  0x33   : > { %v508_v8 = vld [vmem:[%s2413_s20] sm:$0xff]   ;;  %v512_v9 = vld [vmem:[%s2413_s20 + $0x10] sm:$0xff]  }
  0x34   : > { %v516_v10 = vld [vmem:[%s2413_s20 + $0x20] sm:$0xff]   ;;  %509 = vst [vmem:[%s488_s13] sm:$0xff] %v508_v8   ;;  %v520_v11 = vld [vmem:[%s2413_s20 + $0x30] sm:$0xff]  }
  0x35   : > { %513 = vst [vmem:[%s488_s13 + $0x8] sm:$0xff] %v512_v9   ;;  %v524_v12 = vld [vmem:[%s2413_s20 + $0x40] sm:$0xff]   ;;  %v528_v13 = vld [vmem:[%s2413_s20 + $0x50] sm:$0xff]  }
  0x36   : > { %517 = vst [vmem:[%s488_s13 + $0x10] sm:$0xff] %v516_v10   ;;  %v532_v14 = vld [vmem:[%s2413_s20 + $0x60] sm:$0xff]   ;;  %v536_v15 = vld [vmem:[%s2413_s20 + $0x70] sm:$0xff]  }
  0x37   : > { %521 = vst [vmem:[%s488_s13 + $0x18] sm:$0xff] %v520_v11   ;;  %v540_v16 = vld [vmem:[%s2413_s20 + $0x80] sm:$0xff]   ;;  %v544_v17 = vld [vmem:[%s2413_s20 + $0x90] sm:$0xff]  }
  0x38   : > { %525 = vst [vmem:[%s488_s13 + $0x20] sm:$0xff] %v524_v12   ;;  %v548_v18 = vld [vmem:[%s2413_s20 + $0xa0] sm:$0xff]   ;;  %v552_v19 = vld [vmem:[%s2413_s20 + $0xb0] sm:$0xff]  }
  0x39   : > { %529 = vst [vmem:[%s488_s13 + $0x28] sm:$0xff] %v528_v13   ;;  %v556_v20 = vld [vmem:[%s2413_s20 + $0xc0] sm:$0xff]   ;;  %v560_v21 = vld [vmem:[%s2413_s20 + $0xd0] sm:$0xff]  }
  0x3a   : > { %533 = vst [vmem:[%s488_s13 + $0x30] sm:$0xff] %v532_v14   ;;  %v564_v22 = vld [vmem:[%s2413_s20 + $0xe0] sm:$0xff]   ;;  %v568_v23 = vld [vmem:[%s2413_s20 + $0xf0] sm:$0xff]  }
  0x3b   : > { %537 = vst [vmem:[%s488_s13 + $0x38] sm:$0xff] %v536_v15  }
  0x3c   : > { %541 = vst [vmem:[%s488_s13 + $0x40] sm:$0xff] %v540_v16  }
  0x3d   : > { %545 = vst [vmem:[%s488_s13 + $0x48] sm:$0xff] %v544_v17  }
  0x3e   : > { %549 = vst [vmem:[%s488_s13 + $0x50] sm:$0xff] %v548_v18  }
  0x3f   : > { %553 = vst [vmem:[%s488_s13 + $0x58] sm:$0xff] %v552_v19  }
  0x40   : > { %557 = vst [vmem:[%s488_s13 + $0x60] sm:$0xff] %v556_v20  }
  0x41   : > { %561 = vst [vmem:[%s488_s13 + $0x68] sm:$0xff] %v560_v21  }
  0x42   : > { %565 = vst [vmem:[%s488_s13 + $0x70] sm:$0xff] %v564_v22  }
  0x43   : > { %569 = vst [vmem:[%s488_s13 + $0x78] sm:$0xff] %v568_v23  }
  0x44 PF: > { %p1912_p10 = scmp.ge.s32.totalorder %s2276_s24, 1  ;;  %p667_p11 = scmp.lt.s32.totalorder %s2276_s24, 3 }
  0x46   : > { %p668_p12 = pnand %p1912_p10, %p667_p11 }
  0x47   : > { %s2862_s6 = sld [smem:[#allocation11_spill]] (!%p668_p12)  ;;  %s2440_s17 = sand.u32 (!%p668_p12), 1, %s2268_s22  }
  0x48   : > { %671 = sbr.rel (%p668_p12) target bundleno = 492 (0x1ec), region = 142  ;;  %s2863_s8 = sld [smem:[#allocation12_spill]] (!%p668_p12) }
  0x49   : > { %s1916_s18 = sshll.u32 (!%p668_p12), %s2366_s25, 1  ;;  %s1913_s19 = sshll.u32 (!%p668_p12), %s2440_s17, 6 }
  0x4a   : > { %s1914_s20 = sshll.u32 (!%p668_p12), %s2440_s17, 7  ;;  %p738_p13 = scmp.lt.s32.totalorder (!%p668_p12), %s1916_s18, 3 }
  0x4b   : > { %s2445_s13 = scalar_lea.vmem (!%p668_p12), [#allocation2], %s1913_s19  ;;  %s2448_s26 = scalar_lea.vmem (!%p668_p12), [#allocation3], %s1914_s20 }
  0x4c   : > { %s1915_s29 = sshll.u32 (!%p668_p12), %s2440_s17, 3  ;;  %s2041_s16 = sshll.u32 (!%p668_p12), %s2366_s25, 3 }
  0x4d   : > { %v2023_v24 = vld [vmem:[%s2862_s6] sm:$0xff]  ;;  %v2156_v28 = vld [vmem:[%s2448_s26 + $0x38] sm:$0xff]   ;;  %v2143_v29 = vld [vmem:[%s2445_s13 + $0x8] sm:$0xff]   ;;  %s2870_s18 = smov (!%p738_p13, %s1916_s18), 3  ;;  %vm906_vm0 = vcmask 130048   ;;  %s1789_s0 = scalar_lea.hbm %s2849_s12, %s2041_s16 }
  0x4e   : > { %v2024_v25 = vld [vmem:[%s2863_s8] sm:$0xff]  ;;  %938 = vmatpush.bf16.msra.mxu0 %v2023_v24  ;;  %2165 = vmatpush.bf16.msra.mxu3 %v2023_v24  ;;  %v2104_v33 = vunpack.c.l.bf16 %v2156_v28  ;;  %s1917_s28 = sshll.u32 %s2870_s18, 3  ;;  %v2105_v35 = vunpack.c.h.bf16 %v2156_v28  ;;  %v2048_v36 = vunpack.c.l.bf16 %v2143_v29  ;;  %v2150_v39 = vld [vmem:[%s2448_s26 + $0x8] sm:$0xff]   ;;  %v2049_v43 = vunpack.c.h.bf16 %v2143_v29  ;;  %v2144_v10 = vld [vmem:[%s2445_s13 + $0x10] sm:$0xff]   ;;  %s1792_s8 = sshll.u32 %s1789_s0, 4  ;;  %s1793_s8 = int_to_ptr.hbm [resolvable:$true] %s1792_s8 }
  0x4f   : > { %1389 = vmatpush.bf16.msra.mxu1 %v2024_v25  ;;  %v2043_v26 = vld [vmem:[%s2445_s13] sm:$0xff]   ;;  %2166 = vmatpush.bf16.msra.mxu2 %v2024_v25  ;;  %s741_s19 = scalar_lea.vmem %s2838_s1, %s1917_s28  ;;  %s748_s3 = scalar_lea.vmem %s2841_s4, %s1917_s28  ;;  %v2080_v52 = vunpack.c.l.bf16 %v2150_v39  ;;  %v2081_v61 = vunpack.c.h.bf16 %v2150_v39  ;;  %v2052_v22 = vunpack.c.l.bf16 %v2144_v10  ;;  %v2149_v39 = vld [vmem:[%s2445_s13 + $0x38] sm:$0xff]  }
  0x50   : > { %v2075_v27 = vld [vmem:[%s2448_s26] sm:$0xff]   ;;  %v2044_v30 = vunpack.c.l.bf16 %v2043_v26  ;;  %v2045_v31 = vunpack.c.h.bf16 %v2043_v26  ;;  %v2472_v41 = vld [vmem:[%s741_s19 + $0x8] sm:$0xff]  ;;  %s1778_s25 = scalar_lea.sflag [#allocation5], %s2440_s17  ;;  %s2228_s23 = sshra.s32 %s1793_s8, 4  ;;  %s2229_s23 = int_to_ptr.hbm [resolvable:$true] %s2228_s23 }
  0x51   : > { %v2076_v32 = vunpack.c.l.bf16 %v2075_v27  ;;  %v2077_v34 = vunpack.c.h.bf16 %v2075_v27  ;;  %v2462_v37 = vld [vmem:[%s2839_s2] ss:$0 sm:$0xff]  ;;  %v2478_v46 = vld [vmem:[%s748_s3 + $0x8] sm:$0xff]  ;;  %v789_v60 = vsub.f32 %v2049_v43, %v2472_v41  ;;  %s2230_s30 = scalar_lea.hbm %s2229_s23, 8  ;;  %p2235_p3 = scmp.lt.s32.totalorder %s2229_s23, %s2849_s12 }
  0x52   : > { %2167 = vmatpush.bf16.msrb.mxu3 %v2024_v25  ;;  %v2467_v38 = vld [vmem:[%s2842_s5] ss:$0 sm:$0xff]  ;;  %v787_v45 = vsub.f32 %v2045_v31, %v2472_v41  ;;  %v1125_v50 = vsub.f32 %v2105_v35, %v2478_v46  ;;  %v1113_v25 = vsub.f32 %v2081_v61, %v2478_v46  ;;  %v2151_v31 = vld [vmem:[%s2448_s26 + $0x10] sm:$0xff]   ;;  %v2053_v35 = vunpack.c.h.bf16 %v2144_v10  ;;  %p2231_p0 = scmp.ne.s32.totalorder %s2229_s23, %s2230_s30 }
  0x53   : > { %v2470_v40 = vld [vmem:[%s741_s19] sm:$0xff]  ;;  %v1111_v49 = vsub.f32 %v2077_v34, %v2478_v46  ;;  %v809_v13 = vadd.f32 %v2462_v37, %v789_v60 }
  0x54   : > { %v2474_v42 = vld [vmem:[%s748_s3] sm:$0xff]  ;;  %v786_v44 = vsub.f32 %v2044_v30, %v2470_v40  ;;  %v788_v51 = vsub.f32 %v2048_v36, %v2470_v40  ;;  %v807_v54 = vadd.f32 %v2462_v37, %v787_v45  ;;  %v1161_v59 = vadd.f32 %v2467_v38, %v1125_v50  ;;  %s735_s3 = scalar_lea.vmem [#allocation4], %s1915_s29  ;;  %p2232_p1 = pnand %p2231_p0, %p2388_p6 }
  0x55   : > { %v1110_v47 = vsub.f32 %v2076_v32, %v2474_v42  ;;  %v1124_v48 = vsub.f32 %v2104_v33, %v2474_v42  ;;  %v2157_v57 = vld [vmem:[%s2448_s26 + $0x40] sm:$0xff]   ;;  %v1147_v58 = vadd.f32 %v2467_v38, %v1111_v49  ;;  %v1112_v24 = vsub.f32 %v2080_v52, %v2474_v42  ;;  %s1790_s6 = sshll.u32 %s735_s3, 4  ;;  %s1791_s6 = int_to_ptr.vmem [resolvable:$true] %s1790_s6 }
  0x56   : > { %v806_v53 = vadd.f32 %v2462_v37, %v786_v44  ;;  %v823_v63 = vmax.f32 %v807_v54, 0.0  ;;  %v1193_v3 = vmax.f32 %v1161_v59, 0.0  ;;  %v808_v4 = vadd.f32 %v2462_v37, %v788_v51  ;;  %p2233_p2 = pneg %p2232_p1 }
  0x57   : > { %v1146_v55 = vadd.f32 %v2467_v38, %v1110_v47  ;;  %v1160_v56 = vadd.f32 %v2467_v38, %v1124_v48  ;;  %v1179_v2 = vmax.f32 %v1147_v58, 0.0  ;;  %v2108_v5 = vunpack.c.l.bf16 %v2157_v57 }
  0x58   : > { %v822_v62 = vmax.f32 %v806_v53, 0.0  ;;  %v839_v7 = vpack.c.bf16 %v823_v63, %v823_v63  ;;  %v1225_v12 = vpack.c.bf16 %v1193_v3, %v1193_v3  ;;  %v2109_v14 = vunpack.c.h.bf16 %v2157_v57  ;;  %v2158_v63 = vld [vmem:[%s2448_s26 + $0x48] sm:$0xff]  }
  0x59   : > { %v1178_v0 = vmax.f32 %v1146_v55, 0.0  ;;  %v1192_v1 = vmax.f32 %v1160_v56, 0.0  ;;  %v1211_v11 = vpack.c.bf16 %v1179_v2, %v1179_v2  ;;  %v824_v21 = vmax.f32 %v808_v4, 0.0 }
  0x5a   : > { %v838_v6 = vpack.c.bf16 %v822_v62, %v822_v62  ;;  %v877_v16 = vunpack.c.l.b16 %v839_v7  ;;  %v1295_v20 = vunpack.c.l.b16 %v1225_v12  ;;  %v1126_v26 = vsub.f32 %v2108_v5, %v2474_v42 }
  0x5b   : > { %v1210_v8 = vpack.c.bf16 %v1178_v0, %v1178_v0  ;;  %v1224_v9 = vpack.c.bf16 %v1192_v1, %v1192_v1  ;;  %v1281_v19 = vunpack.c.l.b16 %v1211_v11  ;;  %v825_v29 = vmax.f32 %v809_v13, 0.0 }
  0x5c   : > { %v876_v15 = vunpack.c.l.b16 %v838_v6  ;;  %v1127_v30 = vsub.f32 %v2109_v14, %v2478_v46  ;;  %v1148_v32 = vadd.f32 %v2467_v38, %v1112_v24  ;;  %v1149_v33 = vadd.f32 %v2467_v38, %v1113_v25 }
  0x5d   : > { %v1280_v17 = vunpack.c.l.b16 %v1210_v8  ;;  %v1294_v18 = vunpack.c.l.b16 %v1224_v9  ;;  %v1162_v34 = vadd.f32 %v2467_v38, %v1126_v26  ;;  %v2084_v47 = vunpack.c.l.bf16 %v2151_v31 }
  0x5e   : > { %v892_v23 = vpack.c.b16 %v877_v16, %v876_v15  ;;  %v1163_v36 = vadd.f32 %v2467_v38, %v1127_v30  ;;  %v1180_v43 = vmax.f32 %v1148_v32, 0.0  ;;  %v1181_v44 = vmax.f32 %v1149_v33, 0.0 }
  0x5f   : > { %v1312_v27 = vpack.c.b16 %v1281_v19, %v1280_v17  ;;  %v1319_v28 = vpack.c.b16 %v1295_v20, %v1294_v18  ;;  %v1194_v45 = vmax.f32 %v1162_v34, 0.0  ;;  %v840_v48 = vpack.c.bf16 %v824_v21, %v824_v21  ;;  %v2152_v34 = vld [vmem:[%s2448_s26 + $0x18] sm:$0xff]  }
  0x60   : > { %1924 = vmatmul.msk.bf16.vlgmr.msra.gmra.mxu0 %vm906_vm0, %v892_v23  ;;  %v841_v49 = vpack.c.bf16 %v825_v29, %v825_v29  ;;  %v1195_v50 = vmax.f32 %v1163_v36, 0.0  ;;  %v2085_v51 = vunpack.c.h.bf16 %v2151_v31  ;;  %v790_v52 = vsub.f32 %v2052_v22, %v2470_v40  ;;  %v2145_v23 = vld [vmem:[%s2445_s13 + $0x18] sm:$0xff]   ;;  %v2162_v29 = vld [vmem:[%s2448_s26 + $0x68] sm:$0xff]  }
  0x61   : > { %1936 = vmatmul.msk.bf16.vlgmr.msra.gmra.mxu1 %vm906_vm0, %v1312_v27  ;;  %1943 = vmatmul.msk.bf16.vlgmr.msra.gmra.mxu2 %vm906_vm0, %v1319_v28  ;;  %v791_v53 = vsub.f32 %v2053_v35, %v2472_v41  ;;  %v2072_v54 = vunpack.c.l.bf16 %v2149_v39  ;;  %v1212_v55 = vpack.c.bf16 %v1180_v43, %v1180_v43  ;;  %v1213_v56 = vpack.c.bf16 %v1181_v44, %v1181_v44 }
  0x62   : > { %v1226_v57 = vpack.c.bf16 %v1194_v45, %v1194_v45  ;;  %v1227_v58 = vpack.c.bf16 %v1195_v50, %v1195_v50  ;;  %v878_v59 = vunpack.c.l.b16 %v840_v48  ;;  %v879_v60 = vunpack.c.l.b16 %v841_v49 }
  0x63   : > { %v1114_v61 = vsub.f32 %v2084_v47, %v2474_v42  ;;  %v1115_v62 = vsub.f32 %v2085_v51, %v2478_v46  ;;  %v810_v0 = vadd.f32 %v2462_v37, %v790_v52  ;;  %v811_v1 = vadd.f32 %v2462_v37, %v791_v53  ;;  %v2159_v51 = vld [vmem:[%s2448_s26 + $0x50] sm:$0xff]  }
  0x64   : > { %v2073_v2 = vunpack.c.h.bf16 %v2149_v39  ;;  %v800_v3 = vsub.f32 %v2072_v54, %v2470_v40  ;;  %v1282_v4 = vunpack.c.l.b16 %v1212_v55  ;;  %v1283_v5 = vunpack.c.l.b16 %v1213_v56 }
  0x65   : > { %v1296_v6 = vunpack.c.l.b16 %v1226_v57  ;;  %v1297_v7 = vunpack.c.l.b16 %v1227_v58  ;;  %v2112_v10 = vunpack.c.l.bf16 %v2158_v63  ;;  %v2113_v11 = vunpack.c.h.bf16 %v2158_v63 }
  0x66   : > { %v801_v8 = vsub.f32 %v2073_v2, %v2472_v41  ;;  %v820_v9 = vadd.f32 %v2462_v37, %v800_v3  ;;  %v893_v12 = vpack.c.b16 %v879_v60, %v878_v59  ;;  %v1150_v13 = vadd.f32 %v2467_v38, %v1114_v61 }
  0x67   : > { %v1151_v14 = vadd.f32 %v2467_v38, %v1115_v62  ;;  %v1128_v17 = vsub.f32 %v2112_v10, %v2474_v42  ;;  %v1129_v18 = vsub.f32 %v2113_v11, %v2478_v46  ;;  %v1313_v19 = vpack.c.b16 %v1283_v5, %v1282_v4 }
  0x68   : > { %v821_v15 = vadd.f32 %v2462_v37, %v801_v8  ;;  %v836_v16 = vmax.f32 %v820_v9, 0.0  ;;  %v1320_v20 = vpack.c.b16 %v1297_v7, %v1296_v6  ;;  %v826_v21 = vmax.f32 %v810_v0, 0.0 }
  0x69   : > { %v827_v22 = vmax.f32 %v811_v1, 0.0  ;;  %v1164_v26 = vadd.f32 %v2467_v38, %v1128_v17  ;;  %v1165_v27 = vadd.f32 %v2467_v38, %v1129_v18  ;;  %v1182_v28 = vmax.f32 %v1150_v13, 0.0 }
  0x6a   : > { %v837_v24 = vmax.f32 %v821_v15, 0.0  ;;  %v852_v25 = vpack.c.bf16 %v836_v16, %v836_v16  ;;  %v1183_v30 = vmax.f32 %v1151_v14, 0.0  ;;  %v2056_v33 = vunpack.c.l.bf16 %v2145_v23 }
  0x6b   : > { %v842_v35 = vpack.c.bf16 %v826_v21, %v826_v21  ;;  %v843_v36 = vpack.c.bf16 %v827_v22, %v827_v22  ;;  %v1196_v39 = vmax.f32 %v1164_v26, 0.0  ;;  %v1197_v43 = vmax.f32 %v1165_v27, 0.0 }
  0x6c   : > { %v853_v31 = vpack.c.bf16 %v837_v24, %v837_v24  ;;  %v890_v32 = vunpack.c.l.b16 %v852_v25  ;;  %v2057_v45 = vunpack.c.h.bf16 %v2145_v23  ;;  %v2128_v47 = vunpack.c.l.bf16 %v2162_v29  ;;  %v2163_v25 = vld [vmem:[%s2448_s26 + $0x70] sm:$0xff]  }
  0x6d   : > { %v1214_v48 = vpack.c.bf16 %v1182_v28, %v1182_v28  ;;  %v2088_v49 = vunpack.c.l.bf16 %v2152_v34  ;;  %v2089_v50 = vunpack.c.h.bf16 %v2152_v34  ;;  %v1215_v52 = vpack.c.bf16 %v1183_v30, %v1183_v30 }
  0x6e   : > { %v891_v44 = vunpack.c.l.b16 %v853_v31  ;;  %v792_v54 = vsub.f32 %v2056_v33, %v2470_v40  ;;  %v2129_v55 = vunpack.c.h.bf16 %v2162_v29  ;;  %v880_v56 = vunpack.c.l.b16 %v842_v35  ;;  %v2146_v31 = vld [vmem:[%s2445_s13 + $0x20] sm:$0xff]  }
  0x6f   : > { %v881_v57 = vunpack.c.l.b16 %v843_v36  ;;  %v1228_v58 = vpack.c.bf16 %v1196_v39, %v1196_v39  ;;  %v1229_v59 = vpack.c.bf16 %v1197_v43, %v1197_v43  ;;  %v793_v60 = vsub.f32 %v2057_v45, %v2472_v41  ;;  %v2153_v36 = vld [vmem:[%s2448_s26 + $0x20] sm:$0xff]  }
  0x70   : > { %1925 = vmatmul.msk.bf16.gmra.mxu0 %vm906_vm0, %v893_v12  ;;  %v899_v53 = vpack.c.b16 %v891_v44, %v890_v32  ;;  %v1136_v61 = vsub.f32 %v2128_v47, %v2474_v42  ;;  %v1137_v62 = vsub.f32 %v2129_v55, %v2478_v46  ;;  %v2116_v63 = vunpack.c.l.bf16 %v2159_v51  ;;  %v2160_v47 = vld [vmem:[%s2448_s26 + $0x58] sm:$0xff]  }
  0x71   : > { %1937 = vmatmul.msk.bf16.gmra.mxu1 %vm906_vm0, %v1313_v19  ;;  %1944 = vmatmul.msk.bf16.gmra.mxu2 %vm906_vm0, %v1320_v20  ;;  %v1284_v0 = vunpack.c.l.b16 %v1214_v48  ;;  %v1116_v1 = vsub.f32 %v2088_v49, %v2474_v42  ;;  %v1117_v2 = vsub.f32 %v2089_v50, %v2478_v46  ;;  %v2117_v3 = vunpack.c.h.bf16 %v2159_v51 }
  0x72   : > { %1931 = vmatmul.msk.bf16.vlgmr.msra.gmra.mxu3 %vm906_vm0, %v899_v53  ;;  %v1285_v4 = vunpack.c.l.b16 %v1215_v52  ;;  %v812_v5 = vadd.f32 %v2462_v37, %v792_v54  ;;  %v1172_v6 = vadd.f32 %v2467_v38, %v1136_v61  ;;  %v1173_v7 = vadd.f32 %v2467_v38, %v1137_v62 }
  0x73   : > { %v1298_v8 = vunpack.c.l.b16 %v1228_v58  ;;  %v1299_v9 = vunpack.c.l.b16 %v1229_v59  ;;  %v1130_v10 = vsub.f32 %v2116_v63, %v2474_v42  ;;  %v1131_v11 = vsub.f32 %v2117_v3, %v2478_v46 }
  0x74   : > { %v813_v12 = vadd.f32 %v2462_v37, %v793_v60  ;;  %v1204_v13 = vmax.f32 %v1172_v6, 0.0  ;;  %v1205_v14 = vmax.f32 %v1173_v7, 0.0  ;;  %v1152_v15 = vadd.f32 %v2467_v38, %v1116_v1 }
  0x75   : > { %v1153_v16 = vadd.f32 %v2467_v38, %v1117_v2  ;;  %v894_v17 = vpack.c.b16 %v881_v57, %v880_v56  ;;  %v1314_v18 = vpack.c.b16 %v1285_v4, %v1284_v0  ;;  %v1321_v21 = vpack.c.b16 %v1299_v9, %v1298_v8 }
  0x76   : > { %v1236_v19 = vpack.c.bf16 %v1204_v13, %v1204_v13  ;;  %v1237_v20 = vpack.c.bf16 %v1205_v14, %v1205_v14  ;;  %v828_v22 = vmax.f32 %v812_v5, 0.0  ;;  %v1166_v23 = vadd.f32 %v2467_v38, %v1130_v10 }
  0x77   : > { %v1167_v24 = vadd.f32 %v2467_v38, %v1131_v11  ;;  %v829_v26 = vmax.f32 %v813_v12, 0.0  ;;  %v1184_v29 = vmax.f32 %v1152_v15, 0.0  ;;  %v1185_v30 = vmax.f32 %v1153_v16, 0.0  ;;  %v2164_v11 = vld [vmem:[%s2448_s26 + $0x78] sm:$0xff]  }
  0x78   : > { %v1306_v27 = vunpack.c.l.b16 %v1236_v19  ;;  %v1307_v28 = vunpack.c.l.b16 %v1237_v20  ;;  %v2132_v32 = vunpack.c.l.bf16 %v2163_v25  ;;  %v844_v33 = vpack.c.bf16 %v828_v22, %v828_v22 }
  0x79   : > { %v1198_v34 = vmax.f32 %v1166_v23, 0.0  ;;  %v1199_v35 = vmax.f32 %v1167_v24, 0.0  ;;  %v845_v39 = vpack.c.bf16 %v829_v26, %v829_v26  ;;  %v2133_v44 = vunpack.c.h.bf16 %v2163_v25 }
  0x7a   : > { %v1325_v43 = vpack.c.b16 %v1307_v28, %v1306_v27  ;;  %v1138_v45 = vsub.f32 %v2132_v32, %v2474_v42  ;;  %v1216_v48 = vpack.c.bf16 %v1184_v29, %v1184_v29  ;;  %v1217_v49 = vpack.c.bf16 %v1185_v30, %v1185_v30  ;;  %v2147_v32 = vld [vmem:[%s2445_s13 + $0x28] sm:$0xff]  }
  0x7b   : > { %v2060_v50 = vunpack.c.l.bf16 %v2146_v31  ;;  %v2061_v51 = vunpack.c.h.bf16 %v2146_v31  ;;  %v2092_v52 = vunpack.c.l.bf16 %v2153_v36  ;;  %v2093_v53 = vunpack.c.h.bf16 %v2153_v36  ;;  %v2154_v36 = vld [vmem:[%s2448_s26 + $0x28] sm:$0xff]  }
  0x7c   : > { %v1139_v54 = vsub.f32 %v2133_v44, %v2478_v46  ;;  %v1174_v55 = vadd.f32 %v2467_v38, %v1138_v45  ;;  %v1230_v56 = vpack.c.bf16 %v1198_v34, %v1198_v34  ;;  %v1231_v57 = vpack.c.bf16 %v1199_v35, %v1199_v35  ;;  %v2161_v45 = vld [vmem:[%s2448_s26 + $0x60] sm:$0xff]  }
  0x7d   : > { %v2120_v58 = vunpack.c.l.bf16 %v2160_v47  ;;  %v2121_v59 = vunpack.c.h.bf16 %v2160_v47  ;;  %v882_v60 = vunpack.c.l.b16 %v844_v33  ;;  %v883_v63 = vunpack.c.l.b16 %v845_v39 }
  0x7e   : > { %v1175_v61 = vadd.f32 %v2467_v38, %v1139_v54  ;;  %v1206_v62 = vmax.f32 %v1174_v55, 0.0  ;;  %v1286_v0 = vunpack.c.l.b16 %v1216_v48  ;;  %v794_v1 = vsub.f32 %v2060_v50, %v2470_v40 }
  0x7f   : > { %v795_v2 = vsub.f32 %v2061_v51, %v2472_v41  ;;  %v1287_v3 = vunpack.c.l.b16 %v1217_v49  ;;  %v1118_v4 = vsub.f32 %v2092_v52, %v2474_v42  ;;  %v1119_v5 = vsub.f32 %v2093_v53, %v2478_v46 }
  0x80   : > { %1926 = vmatmul.msk.bf16.gmra.mxu0 %vm906_vm0, %v894_v17  ;;  %v1207_v6 = vmax.f32 %v1175_v61, 0.0  ;;  %v1300_v7 = vunpack.c.l.b16 %v1230_v56  ;;  %v1301_v8 = vunpack.c.l.b16 %v1231_v57  ;;  %v1132_v9 = vsub.f32 %v2120_v58, %v2474_v42 }
  0x81   : > { %1938 = vmatmul.msk.bf16.gmra.mxu1 %vm906_vm0, %v1314_v18  ;;  %1945 = vmatmul.msk.bf16.gmra.mxu2 %vm906_vm0, %v1321_v21  ;;  %v1133_v10 = vsub.f32 %v2121_v59, %v2478_v46  ;;  %v1238_v12 = vpack.c.bf16 %v1206_v62, %v1206_v62  ;;  %v814_v14 = vadd.f32 %v2462_v37, %v794_v1  ;;  %v2136_v19 = vunpack.c.l.bf16 %v2164_v11 }
  0x82   : > { %1949 = vmatmul.msk.bf16.vlgmr.msrb.gmra.mxu3 %vm906_vm0, %v1325_v43  ;;  %v1239_v13 = vpack.c.bf16 %v1207_v6, %v1207_v6  ;;  %v815_v15 = vadd.f32 %v2462_v37, %v795_v2  ;;  %v895_v16 = vpack.c.b16 %v883_v63, %v882_v60  ;;  %v1154_v17 = vadd.f32 %v2467_v38, %v1118_v4 }
  0x83   : > { %v1155_v18 = vadd.f32 %v2467_v38, %v1119_v5  ;;  %v1315_v20 = vpack.c.b16 %v1287_v3, %v1286_v0  ;;  %v1322_v21 = vpack.c.b16 %v1301_v8, %v1300_v7  ;;  %v1168_v22 = vadd.f32 %v2467_v38, %v1132_v9 }
  0x84   : > { %v1169_v23 = vadd.f32 %v2467_v38, %v1133_v10  ;;  %v1308_v24 = vunpack.c.l.b16 %v1238_v12  ;;  %v1309_v25 = vunpack.c.l.b16 %v1239_v13  ;;  %v2137_v26 = vunpack.c.h.bf16 %v2164_v11 }
  0x85   : > { %v1140_v27 = vsub.f32 %v2136_v19, %v2474_v42  ;;  %v830_v28 = vmax.f32 %v814_v14, 0.0  ;;  %v831_v29 = vmax.f32 %v815_v15, 0.0  ;;  %v1186_v30 = vmax.f32 %v1154_v17, 0.0 }
  0x86   : > { %v1187_v31 = vmax.f32 %v1155_v18, 0.0  ;;  %v1141_v33 = vsub.f32 %v2137_v26, %v2478_v46  ;;  %v1200_v34 = vmax.f32 %v1168_v22, 0.0  ;;  %v1201_v35 = vmax.f32 %v1169_v23, 0.0 }
  0x87   : > { %v1326_v39 = vpack.c.b16 %v1309_v25, %v1308_v24  ;;  %v1176_v43 = vadd.f32 %v2467_v38, %v1140_v27  ;;  %v846_v47 = vpack.c.bf16 %v830_v28, %v830_v28  ;;  %v847_v48 = vpack.c.bf16 %v831_v29, %v831_v29  ;;  %v2148_v28 = vld [vmem:[%s2445_s13 + $0x30] sm:$0xff]  }
  0x88   : > { %v1177_v44 = vadd.f32 %v2467_v38, %v1141_v33  ;;  %v2064_v49 = vunpack.c.l.bf16 %v2147_v32  ;;  %v2065_v50 = vunpack.c.h.bf16 %v2147_v32  ;;  %v1218_v51 = vpack.c.bf16 %v1186_v30, %v1186_v30  ;;  %v2155_v30 = vld [vmem:[%s2448_s26 + $0x30] sm:$0xff]   ;;  %s2234_s26 = scalar_lea.hbm %s2849_s12, 16 }
  0x89   : > { %v1219_v52 = vpack.c.bf16 %v1187_v31, %v1187_v31  ;;  %v2096_v53 = vunpack.c.l.bf16 %v2154_v36  ;;  %v2097_v54 = vunpack.c.h.bf16 %v2154_v36  ;;  %v1232_v55 = vpack.c.bf16 %v1200_v34, %v1200_v34  ;;  %p2236_p4 = scmp.lt.s32.totalorder %s2234_s26, %s2230_s30 }
  0x8a   : > { %v1233_v56 = vpack.c.bf16 %v1201_v35, %v1201_v35  ;;  %v2124_v57 = vunpack.c.l.bf16 %v2161_v45  ;;  %v2125_v58 = vunpack.c.h.bf16 %v2161_v45  ;;  %v1208_v59 = vmax.f32 %v1176_v43, 0.0 }
  0x8b   : > { %v1209_v60 = vmax.f32 %v1177_v44, 0.0  ;;  %v884_v61 = vunpack.c.l.b16 %v846_v47  ;;  %v885_v62 = vunpack.c.l.b16 %v847_v48  ;;  %v796_v63 = vsub.f32 %v2064_v49, %v2470_v40  ;;  %p2237_p5 = por %p2236_p4, %p2235_p3 }
  0x8c   : > { %v797_v0 = vsub.f32 %v2065_v50, %v2472_v41  ;;  %v1288_v1 = vunpack.c.l.b16 %v1218_v51  ;;  %v1289_v2 = vunpack.c.l.b16 %v1219_v52  ;;  %v1120_v3 = vsub.f32 %v2096_v53, %v2474_v42 }
  0x8d   : > { %v1121_v4 = vsub.f32 %v2097_v54, %v2478_v46  ;;  %v1302_v5 = vunpack.c.l.b16 %v1232_v55  ;;  %v1303_v6 = vunpack.c.l.b16 %v1233_v56  ;;  %v1134_v7 = vsub.f32 %v2124_v57, %v2474_v42  ;;  %p2238_p7 = pnand %p2237_p5, %p2233_p2 }
  0x8e   : > { %v1135_v8 = vsub.f32 %v2125_v58, %v2478_v46  ;;  %v1240_v9 = vpack.c.bf16 %v1208_v59, %v1208_v59  ;;  %v1241_v10 = vpack.c.bf16 %v1209_v60, %v1209_v60  ;;  %v816_v11 = vadd.f32 %v2462_v37, %v796_v63 }
  0x8f   : > { %v817_v12 = vadd.f32 %v2462_v37, %v797_v0  ;;  %v896_v13 = vpack.c.b16 %v885_v62, %v884_v61  ;;  %v1156_v14 = vadd.f32 %v2467_v38, %v1120_v3  ;;  %v1157_v15 = vadd.f32 %v2467_v38, %v1121_v4 }
  0x90   : > { %1927 = vmatmul.msk.bf16.gmra.mxu0 %vm906_vm0, %v895_v16  ;;  %v1316_v16 = vpack.c.b16 %v1289_v2, %v1288_v1  ;;  %v1323_v17 = vpack.c.b16 %v1303_v6, %v1302_v5  ;;  %v1170_v18 = vadd.f32 %v2467_v38, %v1134_v7  ;;  %v1171_v19 = vadd.f32 %v2467_v38, %v1135_v8 }
  0x91   : > { %1939 = vmatmul.msk.bf16.gmra.mxu1 %vm906_vm0, %v1315_v20  ;;  %1946 = vmatmul.msk.bf16.gmra.mxu2 %vm906_vm0, %v1322_v21  ;;  %v1310_v20 = vunpack.c.l.b16 %v1240_v9  ;;  %v1311_v21 = vunpack.c.l.b16 %v1241_v10  ;;  %v832_v22 = vmax.f32 %v816_v11, 0.0  ;;  %v833_v23 = vmax.f32 %v817_v12, 0.0 }
  0x92   : > { %1950 = vmatmul.msk.bf16.gmra.mxu3 %vm906_vm0, %v1326_v39  ;;  %v1188_v24 = vmax.f32 %v1156_v14, 0.0  ;;  %v1189_v25 = vmax.f32 %v1157_v15, 0.0  ;;  %v1202_v26 = vmax.f32 %v1170_v18, 0.0  ;;  %v1203_v27 = vmax.f32 %v1171_v19, 0.0  ;;  %v2634_v18 = vld [vmem:[%s2844_s7] ss:$0 sm:$0xff] }
  0x93   : > { %v1327_v29 = vpack.c.b16 %v1311_v21, %v1310_v20  ;;  %v848_v31 = vpack.c.bf16 %v832_v22, %v832_v22  ;;  %v849_v32 = vpack.c.bf16 %v833_v23, %v833_v23  ;;  %v2068_v35 = vunpack.c.l.bf16 %v2148_v28  ;;  %v2639_v20 = vld [vmem:[%s2846_s9] ss:$0 sm:$0xff] }
  0x94   : > { %v1220_v33 = vpack.c.bf16 %v1188_v24, %v1188_v24  ;;  %v1221_v34 = vpack.c.bf16 %v1189_v25, %v1189_v25  ;;  %v2069_v36 = vunpack.c.h.bf16 %v2148_v28  ;;  %v1234_v39 = vpack.c.bf16 %v1202_v26, %v1202_v26 }
  0x95   : > { %v1235_v43 = vpack.c.bf16 %v1203_v27, %v1203_v27  ;;  %v2100_v44 = vunpack.c.l.bf16 %v2155_v30  ;;  %v2101_v45 = vunpack.c.h.bf16 %v2155_v30  ;;  %v886_v47 = vunpack.c.l.b16 %v848_v31 }
  0x96   : > { %v887_v48 = vunpack.c.l.b16 %v849_v32  ;;  %v1290_v49 = vunpack.c.l.b16 %v1220_v33  ;;  %v1291_v50 = vunpack.c.l.b16 %v1221_v34  ;;  %v798_v51 = vsub.f32 %v2068_v35, %v2470_v40 }
  0x97   : > { %v799_v52 = vsub.f32 %v2069_v36, %v2472_v41  ;;  %v1304_v53 = vunpack.c.l.b16 %v1234_v39  ;;  %v1305_v54 = vunpack.c.l.b16 %v1235_v43  ;;  %v1122_v55 = vsub.f32 %v2100_v44, %v2474_v42  ;;  %v2030_v44 = vld [vmem:[%s2847_s10 + $0x28] sm:$0xff] }
  0x98   : > { %v1123_v56 = vsub.f32 %v2101_v45, %v2478_v46  ;;  %v897_v57 = vpack.c.b16 %v887_v48, %v886_v47  ;;  %v818_v58 = vadd.f32 %v2462_v37, %v798_v51  ;;  %v1317_v60 = vpack.c.b16 %v1291_v50, %v1290_v49 }
  0x99   : > { %v819_v59 = vadd.f32 %v2462_v37, %v799_v52  ;;  %v1324_v61 = vpack.c.b16 %v1305_v54, %v1304_v53  ;;  %v1158_v62 = vadd.f32 %v2467_v38, %v1122_v55 }
  0x9a   : > { %v1159_v63 = vadd.f32 %v2467_v38, %v1123_v56  ;;  %v834_v40 = vmax.f32 %v818_v58, 0.0 }
  0x9b   : > { %v835_v41 = vmax.f32 %v819_v59, 0.0  ;;  %v1190_v42 = vmax.f32 %v1158_v62, 0.0 }
  0x9c   : > { %v1191_v46 = vmax.f32 %v1159_v63, 0.0  ;;  %v850_v0 = vpack.c.bf16 %v834_v40, %v834_v40 }
  0x9d   : > { %v851_v1 = vpack.c.bf16 %v835_v41, %v835_v41  ;;  %v1222_v2 = vpack.c.bf16 %v1190_v42, %v1190_v42  ;;  %v2029_v42 = vld [vmem:[%s2847_s10 + $0x20] sm:$0xff] }
  0x9e   : > { %v1223_v37 = vpack.c.bf16 %v1191_v46, %v1191_v46  ;;  %v888_v3 = vunpack.c.l.b16 %v850_v0 }
  0x9f   : > { %v889_v4 = vunpack.c.l.b16 %v851_v1  ;;  %v1292_v5 = vunpack.c.l.b16 %v1222_v2 }
  0xa0   : > { %1928 = vmatmul.msk.bf16.gmra.mxu0 %vm906_vm0, %v896_v13  ;;  %v1293_v6 = vunpack.c.l.b16 %v1223_v37  ;;  %v2032_v13 = vld [vmem:[%s2847_s10 + $0x38] sm:$0xff] }
  0xa1   : > { %1940 = vmatmul.msk.bf16.gmra.mxu1 %vm906_vm0, %v1316_v16  ;;  %1947 = vmatmul.msk.bf16.gmra.mxu2 %vm906_vm0, %v1323_v17  ;;  %v898_v7 = vpack.c.b16 %v889_v4, %v888_v3  ;;  %v2031_v17 = vld [vmem:[%s2847_s10 + $0x30] sm:$0xff] }
  0xa2   : > { %1951 = vmatmul.msk.bf16.gmra.mxu3 %vm906_vm0, %v1327_v29  ;;  %v1318_v38 = vpack.c.b16 %v1293_v6, %v1292_v5  ;;  %1743 = vmatpush.bf16.msrb.mxu2 %v2032_v13  ;;  %v2028_v6 = vld [vmem:[%s2847_s10 + $0x18] sm:$0xff] }
  0xa6   : > { %1744 = vmatpush.bf16.msrb.mxu2 %v2031_v17 }
  0xaa   : > { %1745 = vmatpush.bf16.msrb.mxu2 %v2030_v44 }
  0xae   : > { %1746 = vmatpush.bf16.msrb.mxu2 %v2029_v42 }
  0xb0   : > { %1929 = vmatmul.msk.bf16.gmra.mxu0 %vm906_vm0, %v897_v57 }
  0xb1   : > { %1941 = vmatmul.msk.bf16.gmra.mxu1 %vm906_vm0, %v1317_v60  ;;  %1948 = vmatmul.msk.bf16.gmra.mxu2 %vm906_vm0, %v1324_v61 }
  0xb2   : > { %1747 = vmatpush.bf16.msrb.mxu2 %v2028_v6 }
  0xc0   : > { %1930 = vmatmul.msk.bf16.gmra.mxu0 %vm906_vm0, %v898_v7 }
  0xc1   : > { %1942 = vmatmul.msk.bf16.gmra.mxu1 %vm906_vm0, %v1318_v38  ;;  %v2040_v38 = vld [vmem:[%s2847_s10 + $0x78] sm:$0xff] }
  0xc2   : > { %1757 = vmatpush.bf16.msra.mxu3 %v2040_v38 }
  0xdd   : > { %v940_v8 = vpop.f32.mrf.mxu0 }
  0xde   : > { %v1391_v9 = vpop.f32.mrf.mxu1  ;;  %v941_v25 = vadd.f32 %v2634_v18, %v940_v8 }
  0xdf   : > { %v1392_v26 = vadd.f32 %v2639_v20, %v1391_v9 }
  0xe0   : > { %v980_v30 = vmax.f32 %v941_v25, 0.0 }
  0xe1   : > { %v1471_v32 = vmax.f32 %v1392_v26, 0.0 }
  0xe2   : > { %v996_v45 = vpack.c.bf16 %v980_v30, %v980_v30 }
  0xe3   : > { %v1503_v48 = vpack.c.bf16 %v1471_v32, %v1471_v32 }
  0xe4   : > { %v1426_v10 = vpop.f32.mrf.mxu2  ;;  %v1012_v54 = vunpack.c.l.bf16 %v996_v45 }
  0xe5   : > { %v2617_v11 = vpop.f32.mrf.mxu0  ;;  %v1427_v24 = vadd.f32 %v2639_v20, %v1426_v10  ;;  %v1535_v57 = vunpack.c.l.bf16 %v1503_v48 }
  0xe6   : > { %v2619_v12 = vpop.f32.mrf.mxu1 }
  0xe7   : > { %v1485_v28 = vmax.f32 %v1427_v24, 0.0  ;;  %v1394_v8 = vadd.f32 %v2639_v20, %v2619_v12 }
  0xe9   : > { %v1517_v39 = vpack.c.bf16 %v1485_v28, %v1485_v28  ;;  %v1472_v24 = vmax.f32 %v1394_v8, 0.0  ;;  %v2036_v8 = vld [vmem:[%s2847_s10 + $0x58] sm:$0xff] }
  0xeb   : > { %v1549_v52 = vunpack.c.l.bf16 %v1517_v39 }
  0xec   : > { %v2624_v14 = vpop.f32.mrf.mxu2 }
  0xed   : > { %v2626_v15 = vpop.f32.mrf.mxu0  ;;  %v1429_v13 = vadd.f32 %v2639_v20, %v2624_v14 }
  0xee   : > { %v1396_v16 = vpop.f32.mrf.mxu1 }
  0xef   : > { %v1397_v23 = vadd.f32 %v2639_v20, %v1396_v16 }
  0xf1   : > { %v1473_v27 = vmax.f32 %v1397_v23, 0.0  ;;  %v2039_v23 = vld [vmem:[%s2847_s10 + $0x70] sm:$0xff] }
  0xf2   : > { %1758 = vmatpush.bf16.msra.mxu3 %v2039_v23 }
  0xf3   : > { %v1505_v36 = vpack.c.bf16 %v1473_v27, %v1473_v27 }
  0xf4   : > { %v1431_v19 = vpop.f32.mrf.mxu2 }
  0xf5   : > { %v2641_v21 = vpop.f32.mrf.mxu0  ;;  %v2647_v29 = vpop.f32.mrf.mxu3  ;;  %v1537_v51 = vunpack.c.l.bf16 %v1505_v36  ;;  %v1432_v9 = vadd.f32 %v2639_v20, %v1431_v19  ;;  %v1486_v19 = vmax.f32 %v1429_v13, 0.0 }
  0xf6   : > { %v1398_v22 = vpop.f32.mrf.mxu1 }
  0xf7   : > { %v2662_v63 = vmax.f32 %v1537_v51, %v1549_v52  ;;  %v1399_v7 = vadd.f32 %v2639_v20, %v1398_v22  ;;  %v1487_v25 = vmax.f32 %v1432_v9, 0.0  ;;  %v1518_v44 = vpack.c.bf16 %v1486_v19, %v1486_v19  ;;  %v2037_v52 = vld [vmem:[%s2847_s10 + $0x60] sm:$0xff] }
  0xf9   : > { %v1474_v22 = vmax.f32 %v1399_v7, 0.0  ;;  %v1519_v36 = vpack.c.bf16 %v1487_v25, %v1487_v25 }
  0xfb   : > { %v1506_v30 = vpack.c.bf16 %v1474_v22, %v1474_v22 }
  0xfc   : > { %v2649_v31 = vpop.f32.mrf.mxu2 }
  0xfd   : > { %v950_v33 = vpop.f32.mrf.mxu0  ;;  %v2658_v60 = vpop.f32.mrf.mxu3  ;;  %v1434_v32 = vadd.f32 %v2639_v20, %v2649_v31 }
  0xfe   : > { %v951_v34 = vadd.f32 %v2634_v18, %v950_v33  ;;  %v1401_v35 = vpop.f32.mrf.mxu1 }
  0xff   : > { %v1402_v43 = vadd.f32 %v2639_v20, %v1401_v35  ;;  %v1504_v35 = vpack.c.bf16 %v1472_v24, %v1472_v24  ;;  %v1488_v51 = vmax.f32 %v1434_v32, 0.0 }
 0x100   : > { %v984_v47 = vmax.f32 %v951_v34, 0.0  ;;  %v2038_v34 = vld [vmem:[%s2847_s10 + $0x68] sm:$0xff] }
 0x101   : > { %v1475_v49 = vmax.f32 %v1402_v43, 0.0  ;;  %v2027_v43 = vld [vmem:[%s2847_s10 + $0x10] sm:$0xff]  ;;  %1759 = vmatpush.bf16.msra.mxu3 %v2038_v34  ;;  %v1520_v38 = vpack.c.bf16 %v1488_v51, %v1488_v51  ;;  %v2025_v51 = vld [vmem:[%s2847_s10] sm:$0xff] }
 0x102   : > { %v1000_v50 = vpack.c.bf16 %v984_v47, %v984_v47  ;;  %1748 = vmatpush.bf16.msrb.mxu2 %v2027_v43 }
 0x103   : > { %v1507_v53 = vpack.c.bf16 %v1475_v49, %v1475_v49  ;;  %v943_v49 = vadd.f32 %v2634_v18, %v2617_v11 }
 0x104   : > { %v1016_v55 = vunpack.c.l.bf16 %v1000_v50  ;;  %v1436_v56 = vpop.f32.mrf.mxu2  ;;  %v1538_v50 = vunpack.c.l.bf16 %v1506_v30 }
 0x105   : > { %v1539_v58 = vunpack.c.l.bf16 %v1507_v53  ;;  %v2656_v59 = vpop.f32.mrf.mxu0  ;;  %v2673_v2 = vpop.f32.mrf.mxu3  ;;  %v1437_v14 = vadd.f32 %v2639_v20, %v1436_v56  ;;  %v1536_v53 = vunpack.c.l.bf16 %v1504_v35  ;;  %1760 = vmatpush.bf16.msra.mxu3 %v2037_v52  ;;  %v981_v6 = vmax.f32 %v943_v49, 0.0  ;;  %v2034_v52 = vld [vmem:[%s2847_s10 + $0x48] sm:$0xff] }
 0x106   : > { %v2660_v61 = vmax.f32 %v1012_v54, %v1016_v55  ;;  %v1403_v62 = vpop.f32.mrf.mxu1  ;;  %v1551_v54 = vunpack.c.l.bf16 %v1519_v36  ;;  %v1457_v23 = vadd.f32 %v2639_v20, %v2673_v2  ;;  %v2035_v2 = vld [vmem:[%s2847_s10 + $0x50] sm:$0xff] }
 0x107   : > { %v2664_v40 = vmax.f32 %v1535_v57, %v1539_v58  ;;  %v1404_v5 = vadd.f32 %v2639_v20, %v1403_v62  ;;  %v1489_v48 = vmax.f32 %v1437_v14, 0.0  ;;  %v946_v58 = vadd.f32 %v2634_v18, %v2626_v15 }
 0x108   : > { %v1550_v62 = vunpack.c.l.bf16 %v1518_v44 }
 0x109   : > { %v1569_v41 = vmax.f32 %v2664_v40, %v2662_v63  ;;  %v1476_v16 = vmax.f32 %v1404_v5, 0.0  ;;  %v1521_v5 = vpack.c.bf16 %v1489_v48, %v1489_v48  ;;  %1761 = vmatpush.bf16.msra.mxu3 %v2036_v8  ;;  %v2738_v40 = vpack.c.bf16 %v981_v6, %v981_v6 }
 0x10a   : > { %v1583_v7 = vmax.f32 %v1538_v50, %v1550_v62  ;;  %v953_v62 = vadd.f32 %v2634_v18, %v2656_v59  ;;  %v2033_v59 = vld [vmem:[%s2847_s10 + $0x40] sm:$0xff] }
 0x10b   : > { %v1508_v27 = vpack.c.bf16 %v1476_v16, %v1476_v16  ;;  %v1570_v9 = vmax.f32 %v1551_v54, %v1569_v41  ;;  %v982_v16 = vmax.f32 %v946_v58, 0.0  ;;  %v948_v41 = vadd.f32 %v2634_v18, %v2641_v21 }
 0x10c   : > { %v1438_v46 = vpop.f32.mrf.mxu2  ;;  %v1013_v48 = vunpack.c.l.bf16 %v2738_v40 }
 0x10d   : > { %v2671_v0 = vpop.f32.mrf.mxu0  ;;  %v2690_v10 = vpop.f32.mrf.mxu3  ;;  %v1540_v45 = vunpack.c.l.bf16 %v1508_v27  ;;  %v1439_v42 = vadd.f32 %v2639_v20, %v1438_v46  ;;  %v2748_v34 = vpack.c.bf16 %v982_v16, %v982_v16  ;;  %1762 = vmatpush.bf16.msra.mxu3 %v2035_v2  ;;  %v983_v49 = vmax.f32 %v948_v41, 0.0 }
 0x10e   : > { %v1406_v1 = vpop.f32.mrf.mxu1 }
 0x10f   : > { %v1407_v17 = vadd.f32 %v2639_v20, %v1406_v1  ;;  %v1582_v1 = vmax.f32 %v1536_v53, %v1540_v45  ;;  %v1490_v22 = vmax.f32 %v1439_v42, 0.0  ;;  %v1014_v58 = vunpack.c.l.bf16 %v2748_v34 }
 0x110   : > { %v2766_v6 = vpack.c.bf16 %v983_v49, %v983_v49 }
 0x111   : > { %v1477_v28 = vmax.f32 %v1407_v17, 0.0  ;;  %v956_v17 = vadd.f32 %v2634_v18, %v2671_v0  ;;  %v1584_v25 = vmax.f32 %v1582_v1, %v1583_v7  ;;  %v2026_v0 = vld [vmem:[%s2847_s10 + $0x8] sm:$0xff]  ;;  %v1522_v36 = vpack.c.bf16 %v1490_v22, %v1490_v22  ;;  %1763 = vmatpush.bf16.msra.mxu3 %v2034_v52 }
 0x112   : > { %1749 = vmatpush.bf16.msrb.mxu2 %v2026_v0  ;;  %v976_v22 = vadd.f32 %v2634_v18, %v2647_v29 }
 0x113   : > { %v1509_v47 = vpack.c.bf16 %v1477_v28, %v1477_v28  ;;  %v986_v35 = vmax.f32 %v956_v17, 0.0  ;;  %v985_v17 = vmax.f32 %v953_v62, 0.0 }
 0x114   : > { %v2677_v4 = vpop.f32.mrf.mxu2  ;;  %v994_v34 = vmax.f32 %v976_v22, 0.0 }
 0x115   : > { %v2675_v37 = vpop.f32.mrf.mxu0  ;;  %v2712_v31 = vpop.f32.mrf.mxu3  ;;  %v1442_v46 = vadd.f32 %v2639_v20, %v2677_v4  ;;  %v1552_v4 = vunpack.c.l.bf16 %v1520_v38  ;;  %1764 = vmatpush.bf16.msra.mxu3 %v2033_v59 }
 0x116   : > { %v1408_v3 = vpop.f32.mrf.mxu1  ;;  %1750 = vmatpush.bf16.msrb.mxu2 %v2025_v51  ;;  %v958_v7 = vadd.f32 %v2634_v18, %v2675_v37  ;;  %v1462_v38 = vadd.f32 %v2639_v20, %v2712_v31 }
 0x117   : > { %v1409_v39 = vadd.f32 %v2639_v20, %v1408_v3  ;;  %v1541_v3 = vunpack.c.l.bf16 %v1509_v47  ;;  %v1491_v14 = vmax.f32 %v1442_v46, 0.0  ;;  %v1585_v43 = vmax.f32 %v1552_v4, %v1584_v25 }
 0x118   : > { %v987_v41 = vmax.f32 %v958_v7, 0.0  ;;  %v1499_v4 = vmax.f32 %v1462_v38, 0.0 }
 0x119   : > { %v1478_v55 = vmax.f32 %v1409_v39, 0.0  ;;  %v1572_v19 = vmax.f32 %v1570_v9, %v1541_v3  ;;  %v1497_v39 = vmax.f32 %v1457_v23, 0.0 }
 0x11b   : > { %v1510_v15 = vpack.c.bf16 %v1478_v55, %v1478_v55  ;;  %v1523_v55 = vpack.c.bf16 %v1491_v14, %v1491_v14 }
 0x11c   : > { %v2703_v33 = vpop.f32.mrf.mxu2 }
 0x11d   : > { %v2698_v12 = vpop.f32.mrf.mxu0  ;;  %v1542_v27 = vunpack.c.l.bf16 %v1510_v15  ;;  %v1463_v32 = vpop.f32.mrf.mxu3  ;;  %v1444_v50 = vadd.f32 %v2639_v20, %v2703_v33  ;;  %v1002_v33 = vpack.c.bf16 %v986_v35, %v986_v35 }
 0x11e   : > { %v1411_v26 = vpop.f32.mrf.mxu1  ;;  %v961_v0 = vadd.f32 %v2634_v18, %v2698_v12  ;;  %v1464_v29 = vadd.f32 %v2639_v20, %v1463_v32 }
 0x11f   : > { %v1412_v56 = vadd.f32 %v2639_v20, %v1411_v26  ;;  %v1553_v26 = vunpack.c.l.bf16 %v1521_v5  ;;  %v1587_v53 = vmax.f32 %v1585_v43, %v1542_v27  ;;  %v1018_v31 = vunpack.c.l.bf16 %v1002_v33 }
 0x120   : > { %v988_v12 = vmax.f32 %v961_v0, 0.0  ;;  %v1500_v51 = vmax.f32 %v1464_v29, 0.0 }
 0x121   : > { %v1479_v13 = vmax.f32 %v1412_v56, 0.0  ;;  %v1574_v44 = vmax.f32 %v1572_v19, %v1553_v26  ;;  %v1459_v56 = vadd.f32 %v2639_v20, %v2690_v10  ;;  %v1492_v10 = vmax.f32 %v1444_v50, 0.0 }
 0x123   : > { %v1511_v28 = vpack.c.bf16 %v1479_v13, %v1479_v13  ;;  %v1576_v1 = vmax.f32 %v1574_v44, %v1497_v39  ;;  %v1555_v13 = vunpack.c.l.bf16 %v1523_v55  ;;  %v1498_v46 = vmax.f32 %v1459_v56, 0.0 }
 0x124   : > { %v1446_v24 = vpop.f32.mrf.mxu2  ;;  %v1524_v2 = vpack.c.bf16 %v1492_v10, %v1492_v10  ;;  %v1001_v39 = vpack.c.bf16 %v985_v17, %v985_v17 }
 0x125   : > { %v2720_v57 = vpop.f32.mrf.mxu0  ;;  %v1543_v54 = vunpack.c.l.bf16 %v1511_v28  ;;  %v1447_v42 = vadd.f32 %v2639_v20, %v1446_v24 }
 0x126   : > { %v1413_v11 = vpop.f32.mrf.mxu1  ;;  %v1556_v49 = vunpack.c.l.bf16 %v1524_v2  ;;  %v963_v7 = vadd.f32 %v2634_v18, %v2720_v57  ;;  %v1017_v38 = vunpack.c.l.bf16 %v1001_v39 }
 0x127   : > { %v1414_v63 = vadd.f32 %v2639_v20, %v1413_v11  ;;  %v1554_v11 = vunpack.c.l.bf16 %v1522_v36  ;;  %v1578_v15 = vmax.f32 %v1576_v1, %v1543_v54  ;;  %v1493_v23 = vmax.f32 %v1447_v42, 0.0 }
 0x129   : > { %v1480_v45 = vmax.f32 %v1414_v63, 0.0  ;;  %v1589_v9 = vmax.f32 %v1587_v53, %v1554_v11  ;;  %v1466_v63 = vpop.f32.mrf.mxu3  ;;  %v1580_v27 = vmax.f32 %v1578_v15, %v1555_v13  ;;  %v1525_v36 = vpack.c.bf16 %v1493_v23, %v1493_v23 }
 0x12a   : > { %v1467_v32 = vadd.f32 %v2639_v20, %v1466_v63 }
 0x12b   : > { %v1512_v3 = vpack.c.bf16 %v1480_v45, %v1480_v45  ;;  %v1591_v28 = vmax.f32 %v1589_v9, %v1498_v46  ;;  %v1029_v45 = vmax.f32 %v1014_v58, %v1018_v31  ;;  %v1571_v50 = vmax.f32 %v1499_v4, %v1580_v27 }
 0x12c   : > { %v1448_v8 = vpop.f32.mrf.mxu2  ;;  %v1557_v55 = vunpack.c.l.bf16 %v1525_v36 }
 0x12d   : > { %v965_v30 = vpop.f32.mrf.mxu0  ;;  %v1544_v25 = vunpack.c.l.bf16 %v1512_v3  ;;  %v1449_v44 = vadd.f32 %v2639_v20, %v1448_v8  ;;  %v978_v8 = vadd.f32 %v2634_v18, %v2658_v60  ;;  %v1035_v60 = vmax.f32 %v1013_v48, %v1017_v38 }
 0x12e   : > { %v1416_v21 = vpop.f32.mrf.mxu1  ;;  %v966_v37 = vadd.f32 %v2634_v18, %v965_v30  ;;  %v1015_v30 = vunpack.c.l.bf16 %v2766_v6  ;;  %v1030_v6 = vmax.f32 %v2660_v61, %v988_v12  ;;  %v989_v61 = vmax.f32 %v963_v7, 0.0 }
 0x12f   : > { %v1417_v47 = vadd.f32 %v2639_v20, %v1416_v21  ;;  %v1593_v21 = vmax.f32 %v1591_v28, %v1544_v25  ;;  %v1494_v58 = vmax.f32 %v1449_v44, 0.0  ;;  %v995_v28 = vmax.f32 %v978_v8, 0.0 }
 0x130   : > { %v990_v35 = vmax.f32 %v966_v37, 0.0  ;;  %v1037_v29 = vmax.f32 %v1035_v60, %v989_v61 }
 0x131   : > { %v1481_v5 = vmax.f32 %v1417_v47, 0.0  ;;  %v1003_v47 = vpack.c.bf16 %v987_v41, %v987_v41  ;;  %v1595_v11 = vmax.f32 %v1593_v21, %v1556_v49  ;;  %v1468_v15 = vpop.f32.mrf.mxu3  ;;  %v1526_v23 = vpack.c.bf16 %v1494_v58, %v1494_v58 }
 0x132   : > { %v1031_v54 = vmax.f32 %v1029_v45, %v990_v35  ;;  %v1469_v57 = vadd.f32 %v2639_v20, %v1468_v15 }
 0x133   : > { %v1513_v19 = vpack.c.bf16 %v1481_v5, %v1481_v5  ;;  %v1019_v5 = vunpack.c.l.bf16 %v1003_v47  ;;  %v1586_v37 = vmax.f32 %v1500_v51, %v1595_v11  ;;  %v1558_v2 = vunpack.c.l.bf16 %v1526_v23  ;;  %v2213_v11 = vld [vmem:[%s2848_s11] ss:$0 sm:$0xff] }
 0x134   : > { %v1451_v42 = vpop.f32.mrf.mxu2  ;;  %v1033_v13 = vmax.f32 %v1031_v54, %v994_v34 }
 0x135   : > { %v967_v16 = vpop.f32.mrf.mxu0  ;;  %v1545_v43 = vunpack.c.l.bf16 %v1513_v19  ;;  %v1452_v19 = vadd.f32 %v2639_v20, %v1451_v42 }
 0x136   : > { %v1418_v24 = vpop.f32.mrf.mxu1  ;;  %v968_v56 = vadd.f32 %v2634_v18, %v967_v16  ;;  %v1501_v16 = vmax.f32 %v1467_v32, 0.0 }
 0x137   : > { %v1419_v26 = vadd.f32 %v2639_v20, %v1418_v24  ;;  %v1573_v1 = vmax.f32 %v1571_v50, %v1545_v43  ;;  %v1036_v24 = vmax.f32 %v1015_v30, %v1019_v5  ;;  %v1495_v39 = vmax.f32 %v1452_v19, 0.0 }
 0x138   : > { %v991_v46 = vmax.f32 %v968_v56, 0.0 }
 0x139   : > { %v1482_v14 = vmax.f32 %v1419_v26, 0.0  ;;  %v1575_v22 = vmax.f32 %v1573_v1, %v1557_v55 }
 0x13a   : > { %v1038_v63 = vmax.f32 %v1036_v24, %v991_v46 }
 0x13b   : > { %v1514_v52 = vpack.c.bf16 %v1482_v14, %v1482_v14  ;;  %v1577_v4 = vmax.f32 %v1575_v22, %v1501_v16  ;;  %v1502_v14 = vmax.f32 %v1469_v57, 0.0 }
 0x13c   : > { %v1453_v34 = vpop.f32.mrf.mxu2  ;;  %v1040_v43 = vmax.f32 %v1038_v63, %v995_v28 }
 0x13d   : > { %v970_v53 = vpop.f32.mrf.mxu0  ;;  %v1546_v59 = vunpack.c.l.bf16 %v1514_v52  ;;  %v1454_v48 = vadd.f32 %v2639_v20, %v1453_v34 }
 0x13e   : > { %v971_v62 = vadd.f32 %v2634_v18, %v970_v53  ;;  %v1421_v33 = vpop.f32.mrf.mxu1 }
 0x13f   : > { %v1422_v3 = vadd.f32 %v2639_v20, %v1421_v33  ;;  %v1588_v25 = vmax.f32 %v1586_v37, %v1546_v59  ;;  %v1496_v50 = vmax.f32 %v1454_v48, 0.0 }
 0x140   : > { %v992_v10 = vmax.f32 %v971_v62, 0.0 }
 0x141   : > { %v1483_v9 = vmax.f32 %v1422_v3, 0.0  ;;  %v1590_v35 = vmax.f32 %v1588_v25, %v1558_v2 }
 0x142   : > { %v1032_v17 = vmax.f32 %v1030_v6, %v992_v10 }
 0x143   : > { %v1579_v36 = vmax.f32 %v1577_v4, %v1483_v9  ;;  %v1592_v47 = vmax.f32 %v1590_v35, %v1502_v14 }
 0x144   : > { %v1034_v31 = vmax.f32 %v1032_v17, %v1033_v13 }
 0x145   : > { %v972_v26 = vpop.f32.mrf.mxu0  ;;  %v1581_v45 = vmax.f32 %v1579_v36, %v1495_v39 }
 0x146   : > { %v973_v41 = vadd.f32 %v2634_v18, %v972_v26  ;;  %v1423_v0 = vpop.f32.mrf.mxu1  ;;  %v1042_v44 = vpack.c.bf16 %v1034_v31, %v1034_v31 }
 0x147   : > { %v1424_v27 = vadd.f32 %v2639_v20, %v1423_v0  ;;  %v1597_v32 = vpack.c.bf16 %v1581_v45, %v1581_v45 }
 0x148   : > { %v993_v30 = vmax.f32 %v973_v41, 0.0  ;;  %v1601_v51 = vunpack.c.l.b16 %v1042_v44 }
 0x149   : > { %v1484_v21 = vmax.f32 %v1424_v27, 0.0  ;;  %v1607_v56 = vunpack.c.l.b16 %v1597_v32 }
 0x14a   : > { %v1039_v40 = vmax.f32 %v1037_v29, %v993_v30 }
 0x14b   : > { %v1594_v49 = vmax.f32 %v1592_v47, %v1484_v21 }
 0x14c   : > { %v1041_v18 = vmax.f32 %v1039_v40, %v1040_v43 }
 0x14d   : > { %v1596_v53 = vmax.f32 %v1594_v49, %v1496_v50 }
 0x14e   : > { %v1043_v12 = vpack.c.bf16 %v1041_v18, %v1041_v18 }
 0x14f   : > { %v1598_v55 = vpack.c.bf16 %v1596_v53, %v1596_v53 }
 0x150   : > { %v1602_v52 = vunpack.c.l.b16 %v1043_v12 }
 0x151   : > { %v1608_v62 = vunpack.c.l.b16 %v1598_v55 }
 0x152   : > { %v1603_v54 = vpack.c.b16 %v1602_v52, %v1601_v51 }
 0x153   : > { %v1609_v33 = vpack.c.b16 %v1608_v62, %v1607_v56 }
 0x154   : > { %1751 = vmatmul.bf16.vlgmr.msrb.gmra.mxu2 %v1603_v54 }
 0x155   : > { %1765 = vmatmul.bf16.vlgmr.msra.gmra.mxu3 %v1609_v33 }
 0x1d7   : > { %v1752_v20 = vpop.f32.mrf.mxu2 }
 0x1d8   : > { %v1766_v42 = vpop.f32.mrf.mxu3  ;;  %v1753_v58 = vadd.f32 %v2213_v11, %v1752_v20 }
 0x1da   : > { %v1767_v5 = vadd.f32 %v1766_v42, %v1753_v58 }
 0x1dc   : > { %v1771_v10 = vmax.f32 %v1767_v5, 0.0 }
 0x1df   : > { %v1754_v1 = vpop.f32.mrf.mxu2 }
 0x1e0   : > { %v1755_v3 = vadd.f32 %v2213_v11, %v1754_v1  ;;  %v1768_v6 = vpop.f32.mrf.mxu3 }
 0x1e2   : > { %v1769_v7 = vadd.f32 %v1768_v6, %v1755_v3 }
 0x1e4   : > { %v1772_v38 = vmax.f32 %v1769_v7, 0.0 }
 0x1e6   : > { %v2141_v8 = vpack.c.bf16 %v1772_v38, %v1771_v10 }
 0x1e8   : > { %2142 = vst [vmem:[%s735_s3] sm:$0xff] %v2141_v8  }
 0x1e9   : > { %2241 = shalt.err (!%p2238_p7)
}
 0x1ea   : > { %s2278_s17 = smov 64   ;;  %s2279_s16 = smov 4  }
 0x1eb   : > { %2168 = dma.vmem_to_hbm [thread:$0]  (%p2388_p6), %s1791_s6, 128, %s1793_s8, %s1778_s25, %s2278_s17, %s2278_s17, %s2279_s16  }
 0x1ec PF: > { %s1807_s19 = sand.u32 1, %s2264_s21   ;;  %p2171_p10 = pnand %p1905_p9, %p2392_p8 }
 0x1ed   : > { %s1808_s20 = scalar_lea.sflag [#allocation5], %s1807_s19 }
 0x1ee   : > { %p2172_p11 = pneg %p2171_p10 }
 0x1f0   : > { %2259 = dma.done.wait (%p2172_p11), %s1808_s20, 128  }
 0x1f1   : > { %2261 = vsyncadd (%p2172_p11), %s1808_s20, 4294967168  ;;  %s2864_s0 = sld [smem:[#allocation7_spill]]  ;;  %p22_p12 = scmp.ge.s32.totalorder %s2370_s27, 4  }
 0x1f2   : > { %s2865_s23 = sld [smem:[#allocation8_spill]]  ;;  %s2866_s21 = smov %s2268_s22 }
 0x1f3   : > { %s2868_s24 = smov %s2370_s27  ;;  %24 = sbr.rel (!%p22_p12) target bundleno = 8 (0x8), region = 204 }
 0x1f7   : > { %s2867_s22 = smov %s2864_s0 }
 0x1f8   :  { %1814 = vsyncpa [#allocation5], 1 }
 0x1f9   :  { %1816 = vsyncpa [#allocation5 + $0x1], 1 }

</bundles_post_ra>
